<compile_context>
chip_gen: v6e
topology: v6e:2x2x1
jax: 0.10.0
libtpu: 0.0.40
codegen_flags: <defaults>
</compile_context>

<pallas_src>
import functools

import jax
import jax.numpy as jnp
from jax.experimental import pallas as pl
from jax.experimental.pallas import tpu as pltpu

# ---------------------------------------------------------------------------
# Config (stand-in for `args` / `config` of the PyTorch module)
# ---------------------------------------------------------------------------
VOCAB_SIZE_V1 = 50          # args.vocab_size_v1
VOCAB_DIM_V1 = 16           # args.vocab_dim_v1
TEXT_DIM = 24               # args.text_dim
# args.text_features: y[3] says whether an MLM loss is computed for that feature
TEXT_FEATURES = [("f0", None, None, True),
                 ("f1", None, None, False),
                 ("f2", None, None, True)]
VOCAB_SIZE = [30, 20, 40]   # args.vocab_size (one lm_head each)
HIDDEN = 64                 # config.hidden_size
NUM_LAYERS = 2              # config.num_hidden_layers
NUM_HEADS = 4               # config.num_attention_heads
INTERMEDIATE = 128          # config.intermediate_size
MAX_POS = 64
LN_EPS = 1e-12

EMB_DIM = VOCAB_DIM_V1 * len(TEXT_FEATURES)          # 48
MLM_IDX = [i for i, f in enumerate(TEXT_FEATURES) if f[3] is True]   # [0, 2]
PAD_V = 128                 # lane-dense padded vocab width per lm head


# ---------------------------------------------------------------------------
# In-kernel helpers (operate on values, not refs)
# ---------------------------------------------------------------------------
def _ln(x, g, b, eps):
    mean = jnp.mean(x, axis=-1, keepdims=True)
    var = jnp.mean(jnp.square(x - mean), axis=-1, keepdims=True)
    return (x - mean) * jax.lax.rsqrt(var + eps) * g + b


# ---------------------------------------------------------------------------
# Kernel 1: stem = text_linear (+ReLU) + BERT embedding add + LayerNorm
# ---------------------------------------------------------------------------
def _stem_kernel(inp_ref, emb_ref, wi_ref, we_ref, b_ref, pos_ref, tok_ref,
                 g_ref, beta_ref, o_ref, *, eps):
    # split-weight matmul == Linear(cat(inputs, emb)); bf16 operands, f32 acc
    y = jnp.dot(inp_ref[0].astype(jnp.bfloat16), wi_ref[...],
                preferred_element_type=jnp.float32)
    y = y + jnp.dot(emb_ref[0].astype(jnp.bfloat16), we_ref[...],
                    preferred_element_type=jnp.float32)
    y = jnp.maximum(y + b_ref[...], 0.0)               # bias + ReLU (f32 epilogue)
    y = y + pos_ref[...] + tok_ref[...]                # BERT embeddings
    o_ref[0] = _ln(y, g_ref[...], beta_ref[...], eps).astype(o_ref.dtype)


def stem(params, inputs, emb):
    B, S, _ = inputs.shape
    rep = lambda shape: pl.BlockSpec(shape, lambda b: (0, 0))
    return pl.pallas_call(
        functools.partial(_stem_kernel, eps=LN_EPS),
        out_shape=jax.ShapeDtypeStruct((B, S, HIDDEN), jnp.float32),
        grid=(B,),
        in_specs=[pl.BlockSpec((1, S, TEXT_DIM), lambda b: (b, 0, 0)),
                  pl.BlockSpec((1, S, EMB_DIM), lambda b: (b, 0, 0)),
                  rep((TEXT_DIM, HIDDEN)),
                  rep((EMB_DIM, HIDDEN)),
                  rep((1, HIDDEN)),
                  rep((S, HIDDEN)),
                  rep((1, HIDDEN)),
                  rep((1, HIDDEN)),
                  rep((1, HIDDEN))],
        out_specs=pl.BlockSpec((1, S, HIDDEN), lambda b: (b, 0, 0)),
        compiler_params=pltpu.CompilerParams(dimension_semantics=("parallel",)),
    )(inputs.astype(jnp.float32), emb.astype(jnp.float32),
      params["text_w_inp"], params["text_w_emb"], params["text_b"],
      params["pos_emb"][:S], params["tok_emb"],
      params["emb_ln_g"], params["emb_ln_b"])


# ---------------------------------------------------------------------------
# Kernel 2: one fused transformer layer (QKV + attention + proj + LN1 + FFN + LN2)
# ---------------------------------------------------------------------------
def _layer_kernel(x_ref, bias_ref, wqkv_ref, bqkv_ref, wo_ref, bo_ref,
                  ln1g_ref, ln1b_ref, w1_ref, b1_ref, w2_ref, b2_ref,
                  ln2g_ref, ln2b_ref, o_ref, *, num_heads, head_dim, eps):
    x = x_ref[0]                                   # (S, H) f32
    bias = bias_ref[0]                             # (1, S) additive mask bias
    hidden = num_heads * head_dim
    scale = 1.0 / (head_dim ** 0.5)

    # fused QKV projection: one lane-dense (S, 3H) matmul, bf16 in / f32 acc
    qkv = jnp.dot(x.astype(jnp.bfloat16), wqkv_ref[...],
                  preferred_element_type=jnp.float32) + bqkv_ref[...]
    q = qkv[:, :hidden]
    k = qkv[:, hidden:2 * hidden]
    v = qkv[:, 2 * hidden:]

    # per-head attention (softmax math in f32; reciprocal goes to the EUP)
    heads = []
    for h in range(num_heads):
        lo, hi = h * head_dim, (h + 1) * head_dim
        qh, kh, vh = q[:, lo:hi], k[:, lo:hi], v[:, lo:hi]
        s = jnp.dot(qh, kh.T, preferred_element_type=jnp.float32) * scale + bias
        s = s - jnp.max(s, axis=-1, keepdims=True)
        p = jnp.exp(s)
        p = p * pl.reciprocal(jnp.sum(p, axis=-1, keepdims=True), approx=True)
        heads.append(jnp.dot(p, vh, preferred_element_type=jnp.float32))
    attn = jnp.concatenate(heads, axis=-1)         # (S, H)

    # output projection + residual + LN1
    proj = jnp.dot(attn.astype(jnp.bfloat16), wo_ref[...],
                   preferred_element_type=jnp.float32) + bo_ref[...]
    y1 = _ln(x + proj, ln1g_ref[...], ln1b_ref[...], eps)

    # FFN + residual + LN2
    ffn = jnp.dot(y1.astype(jnp.bfloat16), w1_ref[...],
                  preferred_element_type=jnp.float32) + b1_ref[...]
    # TODO(synk): HuggingFace BERT uses the exact erf GELU; tanh approximation here.
    ffn = jax.nn.gelu(ffn, approximate=True)
    ffn = jnp.dot(ffn.astype(jnp.bfloat16), w2_ref[...],
                  preferred_element_type=jnp.float32) + b2_ref[...]
    y2 = _ln(y1 + ffn, ln2g_ref[...], ln2b_ref[...], eps)

    o_ref[0] = y2.astype(o_ref.dtype)


def transformer_layer(lp, x, bias):
    B, S, H = x.shape
    rep = lambda shape: pl.BlockSpec(shape, lambda b: (0, 0))
    return pl.pallas_call(
        functools.partial(_layer_kernel, num_heads=NUM_HEADS,
                          head_dim=H // NUM_HEADS, eps=LN_EPS),
        out_shape=jax.ShapeDtypeStruct((B, S, H), jnp.float32),
        grid=(B,),
        in_specs=[pl.BlockSpec((1, S, H), lambda b: (b, 0, 0)),
                  pl.BlockSpec((1, 1, S), lambda b: (b, 0, 0)),
                  rep((H, 3 * H)), rep((1, 3 * H)),
                  rep((H, H)), rep((1, H)),
                  rep((1, H)), rep((1, H)),
                  rep((H, INTERMEDIATE)), rep((1, INTERMEDIATE)),
                  rep((INTERMEDIATE, H)), rep((1, H)),
                  rep((1, H)), rep((1, H))],
        out_specs=pl.BlockSpec((1, S, H), lambda b: (b, 0, 0)),
        compiler_params=pltpu.CompilerParams(dimension_semantics=("parallel",)),
    )(x, bias, lp["w_qkv"], lp["b_qkv"], lp["wo"], lp["bo"],
      lp["ln1_g"], lp["ln1_b"], lp["w1"], lp["b1"], lp["w2"], lp["b2"],
      lp["ln2_g"], lp["ln2_b"])


# ---------------------------------------------------------------------------
# Kernel 3: all MLM heads (stacked, vocab padded to 128) + masked cross-entropy
# ---------------------------------------------------------------------------
def _lm_ce_kernel(x_ref, w_ref, labels_ref, loss_ref, cnt_ref, *, vocab_sizes, pad_v):
    x = x_ref[...].astype(jnp.bfloat16)                          # (M, H)
    logits_all = jnp.dot(x, w_ref[...],
                         preferred_element_type=jnp.float32)     # (M, n*pad_v)
    m_rows = x_ref.shape[0]
    losses, counts = [], []
    for j, v in enumerate(vocab_sizes):
        logits = logits_all[:, j * pad_v:(j + 1) * pad_v]        # (M, pad_v)
        col = jax.lax.broadcasted_iota(jnp.int32, (m_rows, pad_v), 1)
        logits = jnp.where(col < v, logits, -1e30)               # mask pad columns
        lbl = labels_ref[:, j:j + 1]                             # (M, 1) int32
        mx = jnp.max(logits, axis=-1, keepdims=True)
        lse = jnp.log(jnp.sum(jnp.exp(logits - mx), axis=-1, keepdims=True)) + mx
        onehot = (col == lbl).astype(jnp.float32)                # 0 rows for -100
        sel = jnp.sum(onehot * logits, axis=-1, keepdims=True)
        valid = (lbl >= 0).astype(jnp.float32)                   # explicit ignore mask
        losses.append(jnp.sum((lse - sel) * valid, keepdims=True))
        counts.append(jnp.sum(valid, keepdims=True))
    loss_ref[...] = jnp.concatenate(losses, axis=-1)
    cnt_ref[...] = jnp.concatenate(counts, axis=-1)


def lm_heads_ce(outputs, w_stacked, labels_mlm, vocab_sizes):
    n = len(vocab_sizes)
    return pl.pallas_call(
        functools.partial(_lm_ce_kernel, vocab_sizes=tuple(vocab_sizes), pad_v=PAD_V),
        out_shape=(jax.ShapeDtypeStruct((1, n), jnp.float32),
                   jax.ShapeDtypeStruct((1, n), jnp.float32)),
    )(outputs, w_stacked, labels_mlm)


# ---------------------------------------------------------------------------
# Parameter init (Normal(0, 0.02) weights like _init_weights); weights are
# concatenated / padded / cast to bf16 ONCE here (hoisted out of the forward).
# ---------------------------------------------------------------------------
def _normal(key, shape, std=0.02):
    return std * jax.random.normal(key, shape, dtype=jnp.float32)


def init_params(key):
    keys = iter(jax.random.split(key, 64))
    p = {}
    p["text_emb"] = _normal(next(keys), (VOCAB_SIZE_V1, VOCAB_DIM_V1))
    w_text = _normal(next(keys), (TEXT_DIM + EMB_DIM, HIDDEN))
    p["text_w_inp"] = w_text[:TEXT_DIM].astype(jnp.bfloat16)
    p["text_w_emb"] = w_text[TEXT_DIM:].astype(jnp.bfloat16)
    p["text_b"] = jnp.zeros((1, HIDDEN), jnp.float32)
    # minimal BERT encoder params
    p["pos_emb"] = _normal(next(keys), (MAX_POS, HIDDEN))
    p["tok_emb"] = _normal(next(keys), (1, HIDDEN))
    p["emb_ln_g"] = jnp.ones((1, HIDDEN), jnp.float32)
    p["emb_ln_b"] = jnp.zeros((1, HIDDEN), jnp.float32)
    layers = []
    for _ in range(NUM_LAYERS):
        wq = _normal(next(keys), (HIDDEN, HIDDEN))
        wk = _normal(next(keys), (HIDDEN, HIDDEN))
        wv = _normal(next(keys), (HIDDEN, HIDDEN))
        layers.append({
            "w_qkv": jnp.concatenate([wq, wk, wv], axis=1).astype(jnp.bfloat16),
            "b_qkv": jnp.zeros((1, 3 * HIDDEN), jnp.float32),
            "wo": _normal(next(keys), (HIDDEN, HIDDEN)).astype(jnp.bfloat16),
            "bo": jnp.zeros((1, HIDDEN), jnp.float32),
            "ln1_g": jnp.ones((1, HIDDEN), jnp.float32),
            "ln1_b": jnp.zeros((1, HIDDEN), jnp.float32),
            "w1": _normal(next(keys), (HIDDEN, INTERMEDIATE)).astype(jnp.bfloat16),
            "b1": jnp.zeros((1, INTERMEDIATE), jnp.float32),
            "w2": _normal(next(keys), (INTERMEDIATE, HIDDEN)).astype(jnp.bfloat16),
            "b2": jnp.zeros((1, HIDDEN), jnp.float32),
            "ln2_g": jnp.ones((1, HIDDEN), jnp.float32),
            "ln2_b": jnp.zeros((1, HIDDEN), jnp.float32),
        })
    p["layers"] = layers
    # lm heads (Linear(hidden, vocab, bias=False)) — only MLM-active ones,
    # each padded to 128 lanes and stacked into one lane-dense slab.
    lm_padded = []
    for idx in MLM_IDX:
        w = _normal(next(keys), (HIDDEN, VOCAB_SIZE[idx]))
        lm_padded.append(jnp.pad(w, ((0, 0), (0, PAD_V - VOCAB_SIZE[idx]))))
    p["lm_w"] = jnp.concatenate(lm_padded, axis=1).astype(jnp.bfloat16)
    return p


# ---------------------------------------------------------------------------
# Forward pass (mirrors Model.forward)
# ---------------------------------------------------------------------------
def model_forward(params, inputs, inputs_ids, masks, labels):
    B, S, _ = inputs.shape
    # inputs_embedding = text_embeddings(inputs_ids).view(B, S, -1)   (glue gather)
    emb = jnp.take(params["text_emb"], inputs_ids, axis=0).reshape(B, S, -1)
    # attention mask -> additive bias, as HF BERT does
    bias = ((1.0 - masks.astype(jnp.float32)) * -10000.0).reshape(B, 1, S)

    # relu(text_linear(cat)) + embeddings + LN — one kernel
    x = stem(params, inputs, emb)                                  # (B, S, H)
    # encoder layers — one fused kernel each
    for lp in params["layers"]:
        x = transformer_layer(lp, x, bias)
    outputs = x.reshape(B * S, HIDDEN)

    # MLM losses for features whose flag y[3] is True — one fused lm_head+CE kernel
    labels_mlm = jnp.stack([labels[:, :, i] for i in MLM_IDX], axis=-1)
    labels_mlm = labels_mlm.reshape(B * S, len(MLM_IDX)).astype(jnp.int32)
    mlm_vocabs = [VOCAB_SIZE[i] for i in MLM_IDX]
    loss_sums, counts = lm_heads_ce(outputs, params["lm_w"], labels_mlm, mlm_vocabs)
    per_head = jnp.where(counts > 0, loss_sums / jnp.maximum(counts, 1.0), 0.0)
    return jnp.sum(per_head)


# ---------------------------------------------------------------------------
if __name__ == "__main__":
    key = jax.random.PRNGKey(0)
    k_param, k_in, k_ids, k_lbl = jax.random.split(key, 4)

    params = init_params(k_param)

    B, S, F = 2, 8, len(TEXT_FEATURES)
    inputs = jax.random.normal(k_in, (B, S, TEXT_DIM), dtype=jnp.float32)
    inputs_ids = jax.random.randint(k_ids, (B, S, F), 0, VOCAB_SIZE_V1, dtype=jnp.int32)
    masks = jnp.ones((B, S), dtype=jnp.int32).at[1, S - 2:].set(0)

    lbl_keys = jax.random.split(k_lbl, F)
    cols = []
    for idx, vs in enumerate(VOCAB_SIZE):
        tgt = jax.random.randint(lbl_keys[idx], (B, S), 0, vs, dtype=jnp.int32)
        sel = jax.random.bernoulli(jax.random.fold_in(lbl_keys[idx], 1), 0.4, (B, S))
        cols.append(jnp.where(sel, tgt, -100))
    labels = jnp.stack(cols, axis=-1).astype(jnp.int32)
    labels = labels.at[0, 0, :].set(0)   # guarantee >=1 supervised position per head

    forward = jax.jit(model_forward)
    loss = forward(params, inputs, inputs_ids, masks, labels)
    jax.block_until_ready(loss)
    assert loss.shape == () and bool(jnp.isfinite(loss))
    print("KERNEL_OK")
</pallas_src>

<mosaic_0001>
module attributes {stable_mosaic.version = 11 : i64} {
  func.func @_stem_kernel(%arg0: i32, %arg1: memref<1x8x24xf32, #tpu.memory_space<vmem>>, %arg2: memref<1x8x48xf32, #tpu.memory_space<vmem>>, %arg3: memref<24x64xbf16, #tpu.memory_space<vmem>>, %arg4: memref<48x64xbf16, #tpu.memory_space<vmem>>, %arg5: memref<1x64xf32, #tpu.memory_space<vmem>>, %arg6: memref<8x64xf32, #tpu.memory_space<vmem>>, %arg7: memref<1x64xf32, #tpu.memory_space<vmem>>, %arg8: memref<1x64xf32, #tpu.memory_space<vmem>>, %arg9: memref<1x64xf32, #tpu.memory_space<vmem>>, %arg10: memref<1x8x64xf32, #tpu.memory_space<vmem>>) attributes {dimension_semantics = [#tpu.dimension_semantics<parallel>], iteration_bounds = array<i64: 2>, scalar_prefetch = 0 : i64, scratch_operands = 0 : i64, tpu.core_type = #tpu.core_type<tc>, window_params = [{transform_indices = @transform_0, window_bounds = array<i64: 1, 8, 24>}, {transform_indices = @transform_1, window_bounds = array<i64: 1, 8, 48>}, {pipeline_mode = #tpu.pipeline_mode<synchronous>, transform_indices = @transform_2, window_bounds = array<i64: 24, 64>}, {pipeline_mode = #tpu.pipeline_mode<synchronous>, transform_indices = @transform_3, window_bounds = array<i64: 48, 64>}, {pipeline_mode = #tpu.pipeline_mode<synchronous>, transform_indices = @transform_4, window_bounds = array<i64: 1, 64>}, {pipeline_mode = #tpu.pipeline_mode<synchronous>, transform_indices = @transform_5, window_bounds = array<i64: 8, 64>}, {pipeline_mode = #tpu.pipeline_mode<synchronous>, transform_indices = @transform_6, window_bounds = array<i64: 1, 64>}, {pipeline_mode = #tpu.pipeline_mode<synchronous>, transform_indices = @transform_7, window_bounds = array<i64: 1, 64>}, {pipeline_mode = #tpu.pipeline_mode<synchronous>, transform_indices = @transform_8, window_bounds = array<i64: 1, 64>}, {transform_indices = @transform_9, window_bounds = array<i64: 1, 8, 64>}]} {
    %c0 = arith.constant 0 : index
    %c0_0 = arith.constant 0 : index
    %c0_1 = arith.constant 0 : index
    %0 = vector.load %arg1[%c0, %c0_0, %c0_1] : memref<1x8x24xf32, #tpu.memory_space<vmem>>, vector<1x8x24xf32>
    %1 = vector.shape_cast %0 : vector<1x8x24xf32> to vector<8x24xf32>
    %2 = arith.truncf %1 : vector<8x24xf32> to vector<8x24xbf16>
    %c0_2 = arith.constant 0 : index
    %c0_3 = arith.constant 0 : index
    %3 = vector.load %arg3[%c0_2, %c0_3] : memref<24x64xbf16, #tpu.memory_space<vmem>>, vector<24x64xbf16>
    %cst = arith.constant dense<0.000000e+00> : vector<8x64xf32>
    %4 = tpu.matmul %2, %3, %cst {dimension_numbers = #tpu.dot_dimension_numbers<[1], [0], [0], [1], [0, 0, 1, 1], [], []>} : vector<8x24xbf16>, vector<24x64xbf16>, vector<8x64xf32> -> vector<8x64xf32>
    %c0_4 = arith.constant 0 : index
    %c0_5 = arith.constant 0 : index
    %c0_6 = arith.constant 0 : index
    %5 = vector.load %arg2[%c0_4, %c0_5, %c0_6] : memref<1x8x48xf32, #tpu.memory_space<vmem>>, vector<1x8x48xf32>
    %6 = vector.shape_cast %5 : vector<1x8x48xf32> to vector<8x48xf32>
    %7 = arith.truncf %6 : vector<8x48xf32> to vector<8x48xbf16>
    %c0_7 = arith.constant 0 : index
    %c0_8 = arith.constant 0 : index
    %8 = vector.load %arg4[%c0_7, %c0_8] : memref<48x64xbf16, #tpu.memory_space<vmem>>, vector<48x64xbf16>
    %cst_9 = arith.constant dense<0.000000e+00> : vector<8x64xf32>
    %9 = tpu.matmul %7, %8, %cst_9 {dimension_numbers = #tpu.dot_dimension_numbers<[1], [0], [0], [1], [0, 0, 1, 1], [], []>} : vector<8x48xbf16>, vector<48x64xbf16>, vector<8x64xf32> -> vector<8x64xf32>
    %10 = arith.addf %4, %9 : vector<8x64xf32>
    %c0_10 = arith.constant 0 : index
    %c0_11 = arith.constant 0 : index
    %11 = vector.load %arg5[%c0_10, %c0_11] : memref<1x64xf32, #tpu.memory_space<vmem>>, vector<1x64xf32>
    %12 = vector.broadcast %11 : vector<1x64xf32> to vector<8x64xf32>
    %13 = arith.addf %10, %12 : vector<8x64xf32>
    %cst_12 = arith.constant 0.000000e+00 : f32
    %14 = vector.broadcast %cst_12 : f32 to vector<8x64xf32>
    %15 = arith.maximumf %13, %14 : vector<8x64xf32>
    %c0_13 = arith.constant 0 : index
    %c0_14 = arith.constant 0 : index
    %16 = vector.load %arg6[%c0_13, %c0_14] : memref<8x64xf32, #tpu.memory_space<vmem>>, vector<8x64xf32>
    %17 = arith.addf %15, %16 : vector<8x64xf32>
    %c0_15 = arith.constant 0 : index
    %c0_16 = arith.constant 0 : index
    %18 = vector.load %arg7[%c0_15, %c0_16] : memref<1x64xf32, #tpu.memory_space<vmem>>, vector<1x64xf32>
    %19 = vector.broadcast %18 : vector<1x64xf32> to vector<8x64xf32>
    %20 = arith.addf %17, %19 : vector<8x64xf32>
    %c0_17 = arith.constant 0 : index
    %c0_18 = arith.constant 0 : index
    %21 = vector.load %arg8[%c0_17, %c0_18] : memref<1x64xf32, #tpu.memory_space<vmem>>, vector<1x64xf32>
    %c0_19 = arith.constant 0 : index
    %c0_20 = arith.constant 0 : index
    %22 = vector.load %arg9[%c0_19, %c0_20] : memref<1x64xf32, #tpu.memory_space<vmem>>, vector<1x64xf32>
    %cst_21 = arith.constant dense<0.000000e+00> : vector<8xf32>
    %23 = vector.multi_reduction <add>, %20, %cst_21 [1] : vector<8x64xf32> to vector<8xf32>
    %24 = vector.shape_cast %23 : vector<8xf32> to vector<8x1xf32>
    %cst_22 = arith.constant 6.400000e+01 : f32
    %25 = vector.broadcast %cst_22 : f32 to vector<8x1xf32>
    %26 = arith.divf %24, %25 : vector<8x1xf32>
    %27 = vector.broadcast %26 : vector<8x1xf32> to vector<8x64xf32>
    %28 = arith.subf %20, %27 : vector<8x64xf32>
    %29 = arith.mulf %28, %28 : vector<8x64xf32>
    %cst_23 = arith.constant dense<0.000000e+00> : vector<8xf32>
    %30 = vector.multi_reduction <add>, %29, %cst_23 [1] : vector<8x64xf32> to vector<8xf32>
    %31 = vector.shape_cast %30 : vector<8xf32> to vector<8x1xf32>
    %cst_24 = arith.constant 6.400000e+01 : f32
    %32 = vector.broadcast %cst_24 : f32 to vector<8x1xf32>
    %33 = arith.divf %31, %32 : vector<8x1xf32>
    %34 = vector.broadcast %26 : vector<8x1xf32> to vector<8x64xf32>
    %35 = arith.subf %20, %34 : vector<8x64xf32>
    %cst_25 = arith.constant 9.99999996E-13 : f32
    %36 = vector.broadcast %cst_25 : f32 to vector<8x1xf32>
    %37 = arith.addf %33, %36 : vector<8x1xf32>
    %38 = math.rsqrt %37 : vector<8x1xf32>
    %39 = vector.broadcast %38 : vector<8x1xf32> to vector<8x64xf32>
    %40 = arith.mulf %35, %39 : vector<8x64xf32>
    %41 = vector.broadcast %21 : vector<1x64xf32> to vector<8x64xf32>
    %42 = arith.mulf %40, %41 : vector<8x64xf32>
    %43 = vector.broadcast %22 : vector<1x64xf32> to vector<8x64xf32>
    %44 = arith.addf %42, %43 : vector<8x64xf32>
    %c0_26 = arith.constant 0 : index
    %c0_27 = arith.constant 0 : index
    %c0_28 = arith.constant 0 : index
    %45 = vector.load %arg10[%c0_26, %c0_27, %c0_28] : memref<1x8x64xf32, #tpu.memory_space<vmem>>, vector<1x8x64xf32>
    %46 = vector.shape_cast %45 : vector<1x8x64xf32> to vector<8x64xf32>
    %47 = vector.shape_cast %44 : vector<8x64xf32> to vector<1x8x64xf32>
    tpu.vector_store %arg10[%c0_26, %c0_27, %c0_28], %47 {strides = array<i32>} : memref<1x8x64xf32, #tpu.memory_space<vmem>>, vector<1x8x64xf32>,
    return
  }
  func.func @transform_0(%arg0: i32) -> (i32, i32, i32) {
    %c0_i32 = arith.constant 0 : i32
    %c0_i32_0 = arith.constant 0 : i32
    %c0_i32_1 = arith.constant 0 : i32
    return %arg0, %c0_i32, %c0_i32_0 : i32, i32, i32
  }
  func.func @transform_1(%arg0: i32) -> (i32, i32, i32) {
    %c0_i32 = arith.constant 0 : i32
    %c0_i32_0 = arith.constant 0 : i32
    %c0_i32_1 = arith.constant 0 : i32
    return %arg0, %c0_i32, %c0_i32_0 : i32, i32, i32
  }
  func.func @transform_2(%arg0: i32) -> (i32, i32) {
    %c0_i32 = arith.constant 0 : i32
    %c0_i32_0 = arith.constant 0 : i32
    %c0_i32_1 = arith.constant 0 : i32
    return %c0_i32, %c0_i32_0 : i32, i32
  }
  func.func @transform_3(%arg0: i32) -> (i32, i32) {
    %c0_i32 = arith.constant 0 : i32
    %c0_i32_0 = arith.constant 0 : i32
    %c0_i32_1 = arith.constant 0 : i32
    return %c0_i32, %c0_i32_0 : i32, i32
  }
  func.func @transform_4(%arg0: i32) -> (i32, i32) {
    %c0_i32 = arith.constant 0 : i32
    %c0_i32_0 = arith.constant 0 : i32
    %c0_i32_1 = arith.constant 0 : i32
    return %c0_i32, %c0_i32_0 : i32, i32
  }
  func.func @transform_5(%arg0: i32) -> (i32, i32) {
    %c0_i32 = arith.constant 0 : i32
    %c0_i32_0 = arith.constant 0 : i32
    %c0_i32_1 = arith.constant 0 : i32
    return %c0_i32, %c0_i32_0 : i32, i32
  }
  func.func @transform_6(%arg0: i32) -> (i32, i32) {
    %c0_i32 = arith.constant 0 : i32
    %c0_i32_0 = arith.constant 0 : i32
    %c0_i32_1 = arith.constant 0 : i32
    return %c0_i32, %c0_i32_0 : i32, i32
  }
  func.func @transform_7(%arg0: i32) -> (i32, i32) {
    %c0_i32 = arith.constant 0 : i32
    %c0_i32_0 = arith.constant 0 : i32
    %c0_i32_1 = arith.constant 0 : i32
    return %c0_i32, %c0_i32_0 : i32, i32
  }
  func.func @transform_8(%arg0: i32) -> (i32, i32) {
    %c0_i32 = arith.constant 0 : i32
    %c0_i32_0 = arith.constant 0 : i32
    %c0_i32_1 = arith.constant 0 : i32
    return %c0_i32, %c0_i32_0 : i32, i32
  }
  func.func @transform_9(%arg0: i32) -> (i32, i32, i32) {
    %c0_i32 = arith.constant 0 : i32
    %c0_i32_0 = arith.constant 0 : i32
    %c0_i32_1 = arith.constant 0 : i32
    return %arg0, %c0_i32, %c0_i32_0 : i32, i32, i32
  }
}

module attributes {stable_mosaic.version = 11 : i64} {
  func.func @_layer_kernel(%arg0: i32, %arg1: memref<1x8x64xf32, #tpu.memory_space<vmem>>, %arg2: memref<1x1x8xf32, #tpu.memory_space<vmem>>, %arg3: memref<64x192xbf16, #tpu.memory_space<vmem>>, %arg4: memref<1x192xf32, #tpu.memory_space<vmem>>, %arg5: memref<64x64xbf16, #tpu.memory_space<vmem>>, %arg6: memref<1x64xf32, #tpu.memory_space<vmem>>, %arg7: memref<1x64xf32, #tpu.memory_space<vmem>>, %arg8: memref<1x64xf32, #tpu.memory_space<vmem>>, %arg9: memref<64x128xbf16, #tpu.memory_space<vmem>>, %arg10: memref<1x128xf32, #tpu.memory_space<vmem>>, %arg11: memref<128x64xbf16, #tpu.memory_space<vmem>>, %arg12: memref<1x64xf32, #tpu.memory_space<vmem>>, %arg13: memref<1x64xf32, #tpu.memory_space<vmem>>, %arg14: memref<1x64xf32, #tpu.memory_space<vmem>>, %arg15: memref<1x8x64xf32, #tpu.memory_space<vmem>>) attributes {dimension_semantics = [#tpu.dimension_semantics<parallel>], iteration_bounds = array<i64: 2>, scalar_prefetch = 0 : i64, scratch_operands = 0 : i64, tpu.core_type = #tpu.core_type<tc>, window_params = [{transform_indices = @transform_0, window_bounds = array<i64: 1, 8, 64>}, {transform_indices = @transform_1, window_bounds = array<i64: 1, 1, 8>}, {pipeline_mode = #tpu.pipeline_mode<synchronous>, transform_indices = @transform_2, window_bounds = array<i64: 64, 192>}, {pipeline_mode = #tpu.pipeline_mode<synchronous>, transform_indices = @transform_3, window_bounds = array<i64: 1, 192>}, {pipeline_mode = #tpu.pipeline_mode<synchronous>, transform_indices = @transform_4, window_bounds = array<i64: 64, 64>}, {pipeline_mode = #tpu.pipeline_mode<synchronous>, transform_indices = @transform_5, window_bounds = array<i64: 1, 64>}, {pipeline_mode = #tpu.pipeline_mode<synchronous>, transform_indices = @transform_6, window_bounds = array<i64: 1, 64>}, {pipeline_mode = #tpu.pipeline_mode<synchronous>, transform_indices = @transform_7, window_bounds = array<i64: 1, 64>}, {pipeline_mode = #tpu.pipeline_mode<synchronous>, transform_indices = @transform_8, window_bounds = array<i64: 64, 128>}, {pipeline_mode = #tpu.pipeline_mode<synchronous>, transform_indices = @transform_9, window_bounds = array<i64: 1, 128>}, {pipeline_mode = #tpu.pipeline_mode<synchronous>, transform_indices = @transform_10, window_bounds = array<i64: 128, 64>}, {pipeline_mode = #tpu.pipeline_mode<synchronous>, transform_indices = @transform_11, window_bounds = array<i64: 1, 64>}, {pipeline_mode = #tpu.pipeline_mode<synchronous>, transform_indices = @transform_12, window_bounds = array<i64: 1, 64>}, {pipeline_mode = #tpu.pipeline_mode<synchronous>, transform_indices = @transform_13, window_bounds = array<i64: 1, 64>}, {transform_indices = @transform_14, window_bounds = array<i64: 1, 8, 64>}]} {
    %c0 = arith.constant 0 : index
    %c0_0 = arith.constant 0 : index
    %c0_1 = arith.constant 0 : index
    %0 = vector.load %arg1[%c0, %c0_0, %c0_1] : memref<1x8x64xf32, #tpu.memory_space<vmem>>, vector<1x8x64xf32>
    %1 = vector.shape_cast %0 : vector<1x8x64xf32> to vector<8x64xf32>
    %c0_2 = arith.constant 0 : index
    %c0_3 = arith.constant 0 : index
    %c0_4 = arith.constant 0 : index
    %2 = vector.load %arg2[%c0_2, %c0_3, %c0_4] : memref<1x1x8xf32, #tpu.memory_space<vmem>>, vector<1x1x8xf32>
    %3 = vector.shape_cast %2 : vector<1x1x8xf32> to vector<1x8xf32>
    %4 = arith.truncf %1 : vector<8x64xf32> to vector<8x64xbf16>
    %c0_5 = arith.constant 0 : index
    %c0_6 = arith.constant 0 : index
    %5 = vector.load %arg3[%c0_5, %c0_6] : memref<64x192xbf16, #tpu.memory_space<vmem>>, vector<64x192xbf16>
    %cst = arith.constant dense<0.000000e+00> : vector<8x192xf32>
    %6 = tpu.matmul %4, %5, %cst {dimension_numbers = #tpu.dot_dimension_numbers<[1], [0], [0], [1], [0, 0, 1, 1], [], []>} : vector<8x64xbf16>, vector<64x192xbf16>, vector<8x192xf32> -> vector<8x192xf32>
    %c0_7 = arith.constant 0 : index
    %c0_8 = arith.constant 0 : index
    %7 = vector.load %arg4[%c0_7, %c0_8] : memref<1x192xf32, #tpu.memory_space<vmem>>, vector<1x192xf32>
    %8 = vector.broadcast %7 : vector<1x192xf32> to vector<8x192xf32>
    %9 = arith.addf %6, %8 : vector<8x192xf32>
    %10 = vector.extract_strided_slice %9 {offsets = [0, 0], sizes = [8, 64], strides = [1, 1]} : vector<8x192xf32> to vector<8x64xf32>
    %11 = vector.extract_strided_slice %9 {offsets = [0, 64], sizes = [8, 64], strides = [1, 1]} : vector<8x192xf32> to vector<8x64xf32>
    %12 = vector.extract_strided_slice %9 {offsets = [0, 128], sizes = [8, 64], strides = [1, 1]} : vector<8x192xf32> to vector<8x64xf32>
    %13 = vector.extract_strided_slice %10 {offsets = [0, 0], sizes = [8, 16], strides = [1, 1]} : vector<8x64xf32> to vector<8x16xf32>
    %14 = vector.extract_strided_slice %11 {offsets = [0, 0], sizes = [8, 16], strides = [1, 1]} : vector<8x64xf32> to vector<8x16xf32>
    %15 = vector.extract_strided_slice %12 {offsets = [0, 0], sizes = [8, 16], strides = [1, 1]} : vector<8x64xf32> to vector<8x16xf32>
    %16 = tpu.transpose %14, [1, 0] : vector<8x16xf32> -> vector<16x8xf32>
    %cst_9 = arith.constant dense<0.000000e+00> : vector<8x8xf32>
    %17 = tpu.matmul %13, %16, %cst_9 {dimension_numbers = #tpu.dot_dimension_numbers<[1], [0], [0], [1], [0, 0, 1, 1], [], []>} : vector<8x16xf32>, vector<16x8xf32>, vector<8x8xf32> -> vector<8x8xf32>
    %cst_10 = arith.constant 2.500000e-01 : f32
    %18 = vector.broadcast %cst_10 : f32 to vector<8x8xf32>
    %19 = arith.mulf %17, %18 : vector<8x8xf32>
    %20 = vector.broadcast %3 : vector<1x8xf32> to vector<8x8xf32>
    %21 = arith.addf %19, %20 : vector<8x8xf32>
    %cst_11 = arith.constant dense<0xFF800000> : vector<8xf32>
    %22 = vector.multi_reduction <maximumf>, %21, %cst_11 [1] : vector<8x8xf32> to vector<8xf32>
    %23 = vector.shape_cast %22 : vector<8xf32> to vector<8x1xf32>
    %24 = vector.broadcast %23 : vector<8x1xf32> to vector<8x8xf32>
    %25 = arith.subf %21, %24 : vector<8x8xf32>
    %26 = math.exp %25 : vector<8x8xf32>
    %cst_12 = arith.constant dense<0.000000e+00> : vector<8xf32>
    %27 = vector.multi_reduction <add>, %26, %cst_12 [1] : vector<8x8xf32> to vector<8xf32>
    %28 = vector.shape_cast %27 : vector<8xf32> to vector<8x1xf32>
    %29 = tpu.reciprocal %28 {approx = true} : vector<8x1xf32> -> vector<8x1xf32>
    %30 = vector.broadcast %29 : vector<8x1xf32> to vector<8x8xf32>
    %31 = arith.mulf %26, %30 : vector<8x8xf32>
    %cst_13 = arith.constant dense<0.000000e+00> : vector<8x16xf32>
    %32 = tpu.matmul %31, %15, %cst_13 {dimension_numbers = #tpu.dot_dimension_numbers<[1], [0], [0], [1], [0, 0, 1, 1], [], []>} : vector<8x8xf32>, vector<8x16xf32>, vector<8x16xf32> -> vector<8x16xf32>
    %33 = vector.extract_strided_slice %10 {offsets = [0, 16], sizes = [8, 16], strides = [1, 1]} : vector<8x64xf32> to vector<8x16xf32>
    %34 = vector.extract_strided_slice %11 {offsets = [0, 16], sizes = [8, 16], strides = [1, 1]} : vector<8x64xf32> to vector<8x16xf32>
    %35 = vector.extract_strided_slice %12 {offsets = [0, 16], sizes = [8, 16], strides = [1, 1]} : vector<8x64xf32> to vector<8x16xf32>
    %36 = tpu.transpose %34, [1, 0] : vector<8x16xf32> -> vector<16x8xf32>
    %cst_14 = arith.constant dense<0.000000e+00> : vector<8x8xf32>
    %37 = tpu.matmul %33, %36, %cst_14 {dimension_numbers = #tpu.dot_dimension_numbers<[1], [0], [0], [1], [0, 0, 1, 1], [], []>} : vector<8x16xf32>, vector<16x8xf32>, vector<8x8xf32> -> vector<8x8xf32>
    %cst_15 = arith.constant 2.500000e-01 : f32
    %38 = vector.broadcast %cst_15 : f32 to vector<8x8xf32>
    %39 = arith.mulf %37, %38 : vector<8x8xf32>
    %40 = vector.broadcast %3 : vector<1x8xf32> to vector<8x8xf32>
    %41 = arith.addf %39, %40 : vector<8x8xf32>
    %cst_16 = arith.constant dense<0xFF800000> : vector<8xf32>
    %42 = vector.multi_reduction <maximumf>, %41, %cst_16 [1] : vector<8x8xf32> to vector<8xf32>
    %43 = vector.shape_cast %42 : vector<8xf32> to vector<8x1xf32>
    %44 = vector.broadcast %43 : vector<8x1xf32> to vector<8x8xf32>
    %45 = arith.subf %41, %44 : vector<8x8xf32>
    %46 = math.exp %45 : vector<8x8xf32>
    %cst_17 = arith.constant dense<0.000000e+00> : vector<8xf32>
    %47 = vector.multi_reduction <add>, %46, %cst_17 [1] : vector<8x8xf32> to vector<8xf32>
    %48 = vector.shape_cast %47 : vector<8xf32> to vector<8x1xf32>
    %49 = tpu.reciprocal %48 {approx = true} : vector<8x1xf32> -> vector<8x1xf32>
    %50 = vector.broadcast %49 : vector<8x1xf32> to vector<8x8xf32>
    %51 = arith.mulf %46, %50 : vector<8x8xf32>
    %cst_18 = arith.constant dense<0.000000e+00> : vector<8x16xf32>
    %52 = tpu.matmul %51, %35, %cst_18 {dimension_numbers = #tpu.dot_dimension_numbers<[1], [0], [0], [1], [0, 0, 1, 1], [], []>} : vector<8x8xf32>, vector<8x16xf32>, vector<8x16xf32> -> vector<8x16xf32>
    %53 = vector.extract_strided_slice %10 {offsets = [0, 32], sizes = [8, 16], strides = [1, 1]} : vector<8x64xf32> to vector<8x16xf32>
    %54 = vector.extract_strided_slice %11 {offsets = [0, 32], sizes = [8, 16], strides = [1, 1]} : vector<8x64xf32> to vector<8x16xf32>
    %55 = vector.extract_strided_slice %12 {offsets = [0, 32], sizes = [8, 16], strides = [1, 1]} : vector<8x64xf32> to vector<8x16xf32>
    %56 = tpu.transpose %54, [1, 0] : vector<8x16xf32> -> vector<16x8xf32>
    %cst_19 = arith.constant dense<0.000000e+00> : vector<8x8xf32>
    %57 = tpu.matmul %53, %56, %cst_19 {dimension_numbers = #tpu.dot_dimension_numbers<[1], [0], [0], [1], [0, 0, 1, 1], [], []>} : vector<8x16xf32>, vector<16x8xf32>, vector<8x8xf32> -> vector<8x8xf32>
    %cst_20 = arith.constant 2.500000e-01 : f32
    %58 = vector.broadcast %cst_20 : f32 to vector<8x8xf32>
    %59 = arith.mulf %57, %58 : vector<8x8xf32>
    %60 = vector.broadcast %3 : vector<1x8xf32> to vector<8x8xf32>
    %61 = arith.addf %59, %60 : vector<8x8xf32>
    %cst_21 = arith.constant dense<0xFF800000> : vector<8xf32>
    %62 = vector.multi_reduction <maximumf>, %61, %cst_21 [1] : vector<8x8xf32> to vector<8xf32>
    %63 = vector.shape_cast %62 : vector<8xf32> to vector<8x1xf32>
    %64 = vector.broadcast %63 : vector<8x1xf32> to vector<8x8xf32>
    %65 = arith.subf %61, %64 : vector<8x8xf32>
    %66 = math.exp %65 : vector<8x8xf32>
    %cst_22 = arith.constant dense<0.000000e+00> : vector<8xf32>
    %67 = vector.multi_reduction <add>, %66, %cst_22 [1] : vector<8x8xf32> to vector<8xf32>
    %68 = vector.shape_cast %67 : vector<8xf32> to vector<8x1xf32>
    %69 = tpu.reciprocal %68 {approx = true} : vector<8x1xf32> -> vector<8x1xf32>
    %70 = vector.broadcast %69 : vector<8x1xf32> to vector<8x8xf32>
    %71 = arith.mulf %66, %70 : vector<8x8xf32>
    %cst_23 = arith.constant dense<0.000000e+00> : vector<8x16xf32>
    %72 = tpu.matmul %71, %55, %cst_23 {dimension_numbers = #tpu.dot_dimension_numbers<[1], [0], [0], [1], [0, 0, 1, 1], [], []>} : vector<8x8xf32>, vector<8x16xf32>, vector<8x16xf32> -> vector<8x16xf32>
    %73 = vector.extract_strided_slice %10 {offsets = [0, 48], sizes = [8, 16], strides = [1, 1]} : vector<8x64xf32> to vector<8x16xf32>
    %74 = vector.extract_strided_slice %11 {offsets = [0, 48], sizes = [8, 16], strides = [1, 1]} : vector<8x64xf32> to vector<8x16xf32>
    %75 = vector.extract_strided_slice %12 {offsets = [0, 48], sizes = [8, 16], strides = [1, 1]} : vector<8x64xf32> to vector<8x16xf32>
    %76 = tpu.transpose %74, [1, 0] : vector<8x16xf32> -> vector<16x8xf32>
    %cst_24 = arith.constant dense<0.000000e+00> : vector<8x8xf32>
    %77 = tpu.matmul %73, %76, %cst_24 {dimension_numbers = #tpu.dot_dimension_numbers<[1], [0], [0], [1], [0, 0, 1, 1], [], []>} : vector<8x16xf32>, vector<16x8xf32>, vector<8x8xf32> -> vector<8x8xf32>
    %cst_25 = arith.constant 2.500000e-01 : f32
    %78 = vector.broadcast %cst_25 : f32 to vector<8x8xf32>
    %79 = arith.mulf %77, %78 : vector<8x8xf32>
    %80 = vector.broadcast %3 : vector<1x8xf32> to vector<8x8xf32>
    %81 = arith.addf %79, %80 : vector<8x8xf32>
    %cst_26 = arith.constant dense<0xFF800000> : vector<8xf32>
    %82 = vector.multi_reduction <maximumf>, %81, %cst_26 [1] : vector<8x8xf32> to vector<8xf32>
    %83 = vector.shape_cast %82 : vector<8xf32> to vector<8x1xf32>
    %84 = vector.broadcast %83 : vector<8x1xf32> to vector<8x8xf32>
    %85 = arith.subf %81, %84 : vector<8x8xf32>
    %86 = math.exp %85 : vector<8x8xf32>
    %cst_27 = arith.constant dense<0.000000e+00> : vector<8xf32>
    %87 = vector.multi_reduction <add>, %86, %cst_27 [1] : vector<8x8xf32> to vector<8xf32>
    %88 = vector.shape_cast %87 : vector<8xf32> to vector<8x1xf32>
    %89 = tpu.reciprocal %88 {approx = true} : vector<8x1xf32> -> vector<8x1xf32>
    %90 = vector.broadcast %89 : vector<8x1xf32> to vector<8x8xf32>
    %91 = arith.mulf %86, %90 : vector<8x8xf32>
    %cst_28 = arith.constant dense<0.000000e+00> : vector<8x16xf32>
    %92 = tpu.matmul %91, %75, %cst_28 {dimension_numbers = #tpu.dot_dimension_numbers<[1], [0], [0], [1], [0, 0, 1, 1], [], []>} : vector<8x8xf32>, vector<8x16xf32>, vector<8x16xf32> -> vector<8x16xf32>
    %93 = tpu.concatenate %32, %52, %72, %92 in 1 : vector<8x16xf32>, vector<8x16xf32>, vector<8x16xf32>, vector<8x16xf32> -> vector<8x64xf32>
    %94 = arith.truncf %93 : vector<8x64xf32> to vector<8x64xbf16>
    %c0_29 = arith.constant 0 : index
    %c0_30 = arith.constant 0 : index
    %95 = vector.load %arg5[%c0_29, %c0_30] : memref<64x64xbf16, #tpu.memory_space<vmem>>, vector<64x64xbf16>
    %cst_31 = arith.constant dense<0.000000e+00> : vector<8x64xf32>
    %96 = tpu.matmul %94, %95, %cst_31 {dimension_numbers = #tpu.dot_dimension_numbers<[1], [0], [0], [1], [0, 0, 1, 1], [], []>} : vector<8x64xbf16>, vector<64x64xbf16>, vector<8x64xf32> -> vector<8x64xf32>
    %c0_32 = arith.constant 0 : index
    %c0_33 = arith.constant 0 : index
    %97 = vector.load %arg6[%c0_32, %c0_33] : memref<1x64xf32, #tpu.memory_space<vmem>>, vector<1x64xf32>
    %98 = vector.broadcast %97 : vector<1x64xf32> to vector<8x64xf32>
    %99 = arith.addf %96, %98 : vector<8x64xf32>
    %100 = arith.addf %1, %99 : vector<8x64xf32>
    %c0_34 = arith.constant 0 : index
    %c0_35 = arith.constant 0 : index
    %101 = vector.load %arg7[%c0_34, %c0_35] : memref<1x64xf32, #tpu.memory_space<vmem>>, vector<1x64xf32>
    %c0_36 = arith.constant 0 : index
    %c0_37 = arith.constant 0 : index
    %102 = vector.load %arg8[%c0_36, %c0_37] : memref<1x64xf32, #tpu.memory_space<vmem>>, vector<1x64xf32>
    %cst_38 = arith.constant dense<0.000000e+00> : vector<8xf32>
    %103 = vector.multi_reduction <add>, %100, %cst_38 [1] : vector<8x64xf32> to vector<8xf32>
    %104 = vector.shape_cast %103 : vector<8xf32> to vector<8x1xf32>
    %cst_39 = arith.constant 6.400000e+01 : f32
    %105 = vector.broadcast %cst_39 : f32 to vector<8x1xf32>
    %106 = arith.divf %104, %105 : vector<8x1xf32>
    %107 = vector.broadcast %106 : vector<8x1xf32> to vector<8x64xf32>
    %108 = arith.subf %100, %107 : vector<8x64xf32>
    %109 = arith.mulf %108, %108 : vector<8x64xf32>
    %cst_40 = arith.constant dense<0.000000e+00> : vector<8xf32>
    %110 = vector.multi_reduction <add>, %109, %cst_40 [1] : vector<8x64xf32> to vector<8xf32>
    %111 = vector.shape_cast %110 : vector<8xf32> to vector<8x1xf32>
    %cst_41 = arith.constant 6.400000e+01 : f32
    %112 = vector.broadcast %cst_41 : f32 to vector<8x1xf32>
    %113 = arith.divf %111, %112 : vector<8x1xf32>
    %114 = vector.broadcast %106 : vector<8x1xf32> to vector<8x64xf32>
    %115 = arith.subf %100, %114 : vector<8x64xf32>
    %cst_42 = arith.constant 9.99999996E-13 : f32
    %116 = vector.broadcast %cst_42 : f32 to vector<8x1xf32>
    %117 = arith.addf %113, %116 : vector<8x1xf32>
    %118 = math.rsqrt %117 : vector<8x1xf32>
    %119 = vector.broadcast %118 : vector<8x1xf32> to vector<8x64xf32>
    %120 = arith.mulf %115, %119 : vector<8x64xf32>
    %121 = vector.broadcast %101 : vector<1x64xf32> to vector<8x64xf32>
    %122 = arith.mulf %120, %121 : vector<8x64xf32>
    %123 = vector.broadcast %102 : vector<1x64xf32> to vector<8x64xf32>
    %124 = arith.addf %122, %123 : vector<8x64xf32>
    %125 = arith.truncf %124 : vector<8x64xf32> to vector<8x64xbf16>
    %c0_43 = arith.constant 0 : index
    %c0_44 = arith.constant 0 : index
    %126 = vector.load %arg9[%c0_43, %c0_44] : memref<64x128xbf16, #tpu.memory_space<vmem>>, vector<64x128xbf16>
    %cst_45 = arith.constant dense<0.000000e+00> : vector<8x128xf32>
    %127 = tpu.matmul %125, %126, %cst_45 {dimension_numbers = #tpu.dot_dimension_numbers<[1], [0], [0], [1], [0, 0, 1, 1], [], []>} : vector<8x64xbf16>, vector<64x128xbf16>, vector<8x128xf32> -> vector<8x128xf32>
    %c0_46 = arith.constant 0 : index
    %c0_47 = arith.constant 0 : index
    %128 = vector.load %arg10[%c0_46, %c0_47] : memref<1x128xf32, #tpu.memory_space<vmem>>, vector<1x128xf32>
    %129 = vector.broadcast %128 : vector<1x128xf32> to vector<8x128xf32>
    %130 = arith.addf %127, %129 : vector<8x128xf32>
    %131 = arith.mulf %130, %130 : vector<8x128xf32>
    %132 = arith.mulf %130, %131 : vector<8x128xf32>
    %cst_48 = arith.constant 4.471500e-02 : f32
    %133 = vector.broadcast %cst_48 : f32 to vector<8x128xf32>
    %134 = arith.mulf %133, %132 : vector<8x128xf32>
    %135 = arith.addf %130, %134 : vector<8x128xf32>
    %cst_49 = arith.constant 0.797884583 : f32
    %136 = vector.broadcast %cst_49 : f32 to vector<8x128xf32>
    %137 = arith.mulf %136, %135 : vector<8x128xf32>
    %138 = math.tanh %137 : vector<8x128xf32>
    %cst_50 = arith.constant 1.000000e+00 : f32
    %139 = vector.broadcast %cst_50 : f32 to vector<8x128xf32>
    %140 = arith.addf %139, %138 : vector<8x128xf32>
    %cst_51 = arith.constant 5.000000e-01 : f32
    %141 = vector.broadcast %cst_51 : f32 to vector<8x128xf32>
    %142 = arith.mulf %141, %140 : vector<8x128xf32>
    %143 = arith.mulf %130, %142 : vector<8x128xf32>
    %144 = arith.truncf %143 : vector<8x128xf32> to vector<8x128xbf16>
    %c0_52 = arith.constant 0 : index
    %c0_53 = arith.constant 0 : index
    %145 = vector.load %arg11[%c0_52, %c0_53] : memref<128x64xbf16, #tpu.memory_space<vmem>>, vector<128x64xbf16>
    %cst_54 = arith.constant dense<0.000000e+00> : vector<8x64xf32>
    %146 = tpu.matmul %144, %145, %cst_54 {dimension_numbers = #tpu.dot_dimension_numbers<[1], [0], [0], [1], [0, 0, 1, 1], [], []>} : vector<8x128xbf16>, vector<128x64xbf16>, vector<8x64xf32> -> vector<8x64xf32>
    %c0_55 = arith.constant 0 : index
    %c0_56 = arith.constant 0 : index
    %147 = vector.load %arg12[%c0_55, %c0_56] : memref<1x64xf32, #tpu.memory_space<vmem>>, vector<1x64xf32>
    %148 = vector.broadcast %147 : vector<1x64xf32> to vector<8x64xf32>
    %149 = arith.addf %146, %148 : vector<8x64xf32>
    %150 = arith.addf %124, %149 : vector<8x64xf32>
    %c0_57 = arith.constant 0 : index
    %c0_58 = arith.constant 0 : index
    %151 = vector.load %arg13[%c0_57, %c0_58] : memref<1x64xf32, #tpu.memory_space<vmem>>, vector<1x64xf32>
    %c0_59 = arith.constant 0 : index
    %c0_60 = arith.constant 0 : index
    %152 = vector.load %arg14[%c0_59, %c0_60] : memref<1x64xf32, #tpu.memory_space<vmem>>, vector<1x64xf32>
    %cst_61 = arith.constant dense<0.000000e+00> : vector<8xf32>
    %153 = vector.multi_reduction <add>, %150, %cst_61 [1] : vector<8x64xf32> to vector<8xf32>
    %154 = vector.shape_cast %153 : vector<8xf32> to vector<8x1xf32>
    %cst_62 = arith.constant 6.400000e+01 : f32
    %155 = vector.broadcast %cst_62 : f32 to vector<8x1xf32>
    %156 = arith.divf %154, %155 : vector<8x1xf32>
    %157 = vector.broadcast %156 : vector<8x1xf32> to vector<8x64xf32>
    %158 = arith.subf %150, %157 : vector<8x64xf32>
    %159 = arith.mulf %158, %158 : vector<8x64xf32>
    %cst_63 = arith.constant dense<0.000000e+00> : vector<8xf32>
    %160 = vector.multi_reduction <add>, %159, %cst_63 [1] : vector<8x64xf32> to vector<8xf32>
    %161 = vector.shape_cast %160 : vector<8xf32> to vector<8x1xf32>
    %cst_64 = arith.constant 6.400000e+01 : f32
    %162 = vector.broadcast %cst_64 : f32 to vector<8x1xf32>
    %163 = arith.divf %161, %162 : vector<8x1xf32>
    %164 = vector.broadcast %156 : vector<8x1xf32> to vector<8x64xf32>
    %165 = arith.subf %150, %164 : vector<8x64xf32>
    %cst_65 = arith.constant 9.99999996E-13 : f32
    %166 = vector.broadcast %cst_65 : f32 to vector<8x1xf32>
    %167 = arith.addf %163, %166 : vector<8x1xf32>
    %168 = math.rsqrt %167 : vector<8x1xf32>
    %169 = vector.broadcast %168 : vector<8x1xf32> to vector<8x64xf32>
    %170 = arith.mulf %165, %169 : vector<8x64xf32>
    %171 = vector.broadcast %151 : vector<1x64xf32> to vector<8x64xf32>
    %172 = arith.mulf %170, %171 : vector<8x64xf32>
    %173 = vector.broadcast %152 : vector<1x64xf32> to vector<8x64xf32>
    %174 = arith.addf %172, %173 : vector<8x64xf32>
    %c0_66 = arith.constant 0 : index
    %c0_67 = arith.constant 0 : index
    %c0_68 = arith.constant 0 : index
    %175 = vector.load %arg15[%c0_66, %c0_67, %c0_68] : memref<1x8x64xf32, #tpu.memory_space<vmem>>, vector<1x8x64xf32>
    %176 = vector.shape_cast %175 : vector<1x8x64xf32> to vector<8x64xf32>
    %177 = vector.shape_cast %174 : vector<8x64xf32> to vector<1x8x64xf32>
    tpu.vector_store %arg15[%c0_66, %c0_67, %c0_68], %177 {strides = array<i32>} : memref<1x8x64xf32, #tpu.memory_space<vmem>>, vector<1x8x64xf32>,
    return
  }
  func.func @transform_0(%arg0: i32) -> (i32, i32, i32) {
    %c0_i32 = arith.constant 0 : i32
    %c0_i32_0 = arith.constant 0 : i32
    %c0_i32_1 = arith.constant 0 : i32
    return %arg0, %c0_i32, %c0_i32_0 : i32, i32, i32
  }
  func.func @transform_1(%arg0: i32) -> (i32, i32, i32) {
    %c0_i32 = arith.constant 0 : i32
    %c0_i32_0 = arith.constant 0 : i32
    %c0_i32_1 = arith.constant 0 : i32
    return %arg0, %c0_i32, %c0_i32_0 : i32, i32, i32
  }
  func.func @transform_2(%arg0: i32) -> (i32, i32) {
    %c0_i32 = arith.constant 0 : i32
    %c0_i32_0 = arith.constant 0 : i32
    %c0_i32_1 = arith.constant 0 : i32
    return %c0_i32, %c0_i32_0 : i32, i32
  }
  func.func @transform_3(%arg0: i32) -> (i32, i32) {
    %c0_i32 = arith.constant 0 : i32
    %c0_i32_0 = arith.constant 0 : i32
    %c0_i32_1 = arith.constant 0 : i32
    return %c0_i32, %c0_i32_0 : i32, i32
  }
  func.func @transform_4(%arg0: i32) -> (i32, i32) {
    %c0_i32 = arith.constant 0 : i32
    %c0_i32_0 = arith.constant 0 : i32
    %c0_i32_1 = arith.constant 0 : i32
    return %c0_i32, %c0_i32_0 : i32, i32
  }
  func.func @transform_5(%arg0: i32) -> (i32, i32) {
    %c0_i32 = arith.constant 0 : i32
    %c0_i32_0 = arith.constant 0 : i32
    %c0_i32_1 = arith.constant 0 : i32
    return %c0_i32, %c0_i32_0 : i32, i32
  }
  func.func @transform_6(%arg0: i32) -> (i32, i32) {
    %c0_i32 = arith.constant 0 : i32
    %c0_i32_0 = arith.constant 0 : i32
    %c0_i32_1 = arith.constant 0 : i32
    return %c0_i32, %c0_i32_0 : i32, i32
  }
  func.func @transform_7(%arg0: i32) -> (i32, i32) {
    %c0_i32 = arith.constant 0 : i32
    %c0_i32_0 = arith.constant 0 : i32
    %c0_i32_1 = arith.constant 0 : i32
    return %c0_i32, %c0_i32_0 : i32, i32
  }
  func.func @transform_8(%arg0: i32) -> (i32, i32) {
    %c0_i32 = arith.constant 0 : i32
    %c0_i32_0 = arith.constant 0 : i32
    %c0_i32_1 = arith.constant 0 : i32
    return %c0_i32, %c0_i32_0 : i32, i32
  }
  func.func @transform_9(%arg0: i32) -> (i32, i32) {
    %c0_i32 = arith.constant 0 : i32
    %c0_i32_0 = arith.constant 0 : i32
    %c0_i32_1 = arith.constant 0 : i32
    return %c0_i32, %c0_i32_0 : i32, i32
  }
  func.func @transform_10(%arg0: i32) -> (i32, i32) {
    %c0_i32 = arith.constant 0 : i32
    %c0_i32_0 = arith.constant 0 : i32
    %c0_i32_1 = arith.constant 0 : i32
    return %c0_i32, %c0_i32_0 : i32, i32
  }
  func.func @transform_11(%arg0: i32) -> (i32, i32) {
    %c0_i32 = arith.constant 0 : i32
    %c0_i32_0 = arith.constant 0 : i32
    %c0_i32_1 = arith.constant 0 : i32
    return %c0_i32, %c0_i32_0 : i32, i32
  }
  func.func @transform_12(%arg0: i32) -> (i32, i32) {
    %c0_i32 = arith.constant 0 : i32
    %c0_i32_0 = arith.constant 0 : i32
    %c0_i32_1 = arith.constant 0 : i32
    return %c0_i32, %c0_i32_0 : i32, i32
  }
  func.func @transform_13(%arg0: i32) -> (i32, i32) {
    %c0_i32 = arith.constant 0 : i32
    %c0_i32_0 = arith.constant 0 : i32
    %c0_i32_1 = arith.constant 0 : i32
    return %c0_i32, %c0_i32_0 : i32, i32
  }
  func.func @transform_14(%arg0: i32) -> (i32, i32, i32) {
    %c0_i32 = arith.constant 0 : i32
    %c0_i32_0 = arith.constant 0 : i32
    %c0_i32_1 = arith.constant 0 : i32
    return %arg0, %c0_i32, %c0_i32_0 : i32, i32, i32
  }
}

module attributes {stable_mosaic.version = 11 : i64} {
  func.func @_lm_ce_kernel(%arg0: memref<16x64xf32, #tpu.memory_space<vmem>>, %arg1: memref<64x256xbf16, #tpu.memory_space<vmem>>, %arg2: memref<16x2xi32, #tpu.memory_space<vmem>>, %arg3: memref<1x2xf32, #tpu.memory_space<vmem>>, %arg4: memref<1x2xf32, #tpu.memory_space<vmem>>) attributes {dimension_semantics = [], scalar_prefetch = 0 : i64, scratch_operands = 0 : i64, tpu.core_type = #tpu.core_type<tc>} {
    %c0 = arith.constant 0 : index
    %c0_0 = arith.constant 0 : index
    %0 = vector.load %arg0[%c0, %c0_0] : memref<16x64xf32, #tpu.memory_space<vmem>>, vector<16x64xf32>
    %1 = arith.truncf %0 : vector<16x64xf32> to vector<16x64xbf16>
    %c0_1 = arith.constant 0 : index
    %c0_2 = arith.constant 0 : index
    %2 = vector.load %arg1[%c0_1, %c0_2] : memref<64x256xbf16, #tpu.memory_space<vmem>>, vector<64x256xbf16>
    %cst = arith.constant dense<0.000000e+00> : vector<16x256xf32>
    %3 = tpu.matmul %1, %2, %cst {dimension_numbers = #tpu.dot_dimension_numbers<[1], [0], [0], [1], [0, 0, 1, 1], [], []>} : vector<16x64xbf16>, vector<64x256xbf16>, vector<16x256xf32> -> vector<16x256xf32>
    %4 = vector.extract_strided_slice %3 {offsets = [0, 0], sizes = [16, 128], strides = [1, 1]} : vector<16x256xf32> to vector<16x128xf32>
    %5 = tpu.iota {dimensions = array<i32: 1>} : vector<16x128xi32>
    %c30_i32 = arith.constant 30 : i32
    %6 = vector.broadcast %c30_i32 : i32 to vector<16x128xi32>
    %7 = arith.cmpi slt, %5, %6 : vector<16x128xi32>
    %cst_3 = arith.constant -1.000000e+30 : f32
    %8 = vector.broadcast %cst_3 : f32 to vector<16x128xf32>
    %9 = arith.select %7, %4, %8 : vector<16x128xi1>, vector<16x128xf32>
    %c0_4 = arith.constant 0 : index
    %c0_5 = arith.constant 0 : index
    %10 = vector.load %arg2[%c0_4, %c0_5] : memref<16x2xi32, #tpu.memory_space<vmem>>, vector<16x1xi32>
    %cst_6 = arith.constant dense<0xFF800000> : vector<16xf32>
    %11 = vector.multi_reduction <maximumf>, %9, %cst_6 [1] : vector<16x128xf32> to vector<16xf32>
    %12 = vector.shape_cast %11 : vector<16xf32> to vector<16x1xf32>
    %13 = vector.broadcast %12 : vector<16x1xf32> to vector<16x128xf32>
    %14 = arith.subf %9, %13 : vector<16x128xf32>
    %15 = math.exp %14 : vector<16x128xf32>
    %cst_7 = arith.constant dense<0.000000e+00> : vector<16xf32>
    %16 = vector.multi_reduction <add>, %15, %cst_7 [1] : vector<16x128xf32> to vector<16xf32>
    %17 = vector.shape_cast %16 : vector<16xf32> to vector<16x1xf32>
    %18 = math.log %17 : vector<16x1xf32>
    %19 = arith.addf %18, %12 : vector<16x1xf32>
    %20 = vector.broadcast %10 : vector<16x1xi32> to vector<16x128xi32>
    %21 = arith.cmpi eq, %5, %20 : vector<16x128xi32>
    %22 = arith.extui %21 : vector<16x128xi1> to vector<16x128xi32>
    %23 = arith.sitofp %22 : vector<16x128xi32> to vector<16x128xf32>
    %24 = arith.mulf %23, %9 : vector<16x128xf32>
    %cst_8 = arith.constant dense<0.000000e+00> : vector<16xf32>
    %25 = vector.multi_reduction <add>, %24, %cst_8 [1] : vector<16x128xf32> to vector<16xf32>
    %26 = vector.shape_cast %25 : vector<16xf32> to vector<16x1xf32>
    %c0_i32 = arith.constant 0 : i32
    %27 = vector.broadcast %c0_i32 : i32 to vector<16x1xi32>
    %28 = arith.cmpi sge, %10, %27 : vector<16x1xi32>
    %29 = arith.extui %28 : vector<16x1xi1> to vector<16x1xi32>
    %30 = arith.sitofp %29 : vector<16x1xi32> to vector<16x1xf32>
    %31 = arith.subf %19, %26 : vector<16x1xf32>
    %32 = arith.mulf %31, %30 : vector<16x1xf32>
    %33 = vector.shape_cast %32 : vector<16x1xf32> to vector<1x16x1xf32>
    %cst_9 = arith.constant dense<0.000000e+00> : vector<1xf32>
    %34 = vector.multi_reduction <add>, %33, %cst_9 [1, 2] : vector<1x16x1xf32> to vector<1xf32>
    %35 = vector.shape_cast %34 : vector<1xf32> to vector<1x1x1xf32>
    %36 = vector.extract %35[0, 0, 0] : f32 from vector<1x1x1xf32>
    %37 = vector.broadcast %36 : f32 to vector<1x1xf32>
    %38 = vector.shape_cast %30 : vector<16x1xf32> to vector<1x16x1xf32>
    %cst_10 = arith.constant dense<0.000000e+00> : vector<1xf32>
    %39 = vector.multi_reduction <add>, %38, %cst_10 [1, 2] : vector<1x16x1xf32> to vector<1xf32>
    %40 = vector.shape_cast %39 : vector<1xf32> to vector<1x1x1xf32>
    %41 = vector.extract %40[0, 0, 0] : f32 from vector<1x1x1xf32>
    %42 = vector.broadcast %41 : f32 to vector<1x1xf32>
    %43 = vector.extract_strided_slice %3 {offsets = [0, 128], sizes = [16, 128], strides = [1, 1]} : vector<16x256xf32> to vector<16x128xf32>
    %44 = tpu.iota {dimensions = array<i32: 1>} : vector<16x128xi32>
    %c40_i32 = arith.constant 40 : i32
    %45 = vector.broadcast %c40_i32 : i32 to vector<16x128xi32>
    %46 = arith.cmpi slt, %44, %45 : vector<16x128xi32>
    %cst_11 = arith.constant -1.000000e+30 : f32
    %47 = vector.broadcast %cst_11 : f32 to vector<16x128xf32>
    %48 = arith.select %46, %43, %47 : vector<16x128xi1>, vector<16x128xf32>
    %c0_12 = arith.constant 0 : index
    %c1 = arith.constant 1 : index
    %49 = vector.load %arg2[%c0_12, %c1] : memref<16x2xi32, #tpu.memory_space<vmem>>, vector<16x1xi32>
    %cst_13 = arith.constant dense<0xFF800000> : vector<16xf32>
    %50 = vector.multi_reduction <maximumf>, %48, %cst_13 [1] : vector<16x128xf32> to vector<16xf32>
    %51 = vector.shape_cast %50 : vector<16xf32> to vector<16x1xf32>
    %52 = vector.broadcast %51 : vector<16x1xf32> to vector<16x128xf32>
    %53 = arith.subf %48, %52 : vector<16x128xf32>
    %54 = math.exp %53 : vector<16x128xf32>
    %cst_14 = arith.constant dense<0.000000e+00> : vector<16xf32>
    %55 = vector.multi_reduction <add>, %54, %cst_14 [1] : vector<16x128xf32> to vector<16xf32>
    %56 = vector.shape_cast %55 : vector<16xf32> to vector<16x1xf32>
    %57 = math.log %56 : vector<16x1xf32>
    %58 = arith.addf %57, %51 : vector<16x1xf32>
    %59 = vector.broadcast %49 : vector<16x1xi32> to vector<16x128xi32>
    %60 = arith.cmpi eq, %44, %59 : vector<16x128xi32>
    %61 = arith.extui %60 : vector<16x128xi1> to vector<16x128xi32>
    %62 = arith.sitofp %61 : vector<16x128xi32> to vector<16x128xf32>
    %63 = arith.mulf %62, %48 : vector<16x128xf32>
    %cst_15 = arith.constant dense<0.000000e+00> : vector<16xf32>
    %64 = vector.multi_reduction <add>, %63, %cst_15 [1] : vector<16x128xf32> to vector<16xf32>
    %65 = vector.shape_cast %64 : vector<16xf32> to vector<16x1xf32>
    %c0_i32_16 = arith.constant 0 : i32
    %66 = vector.broadcast %c0_i32_16 : i32 to vector<16x1xi32>
    %67 = arith.cmpi sge, %49, %66 : vector<16x1xi32>
    %68 = arith.extui %67 : vector<16x1xi1> to vector<16x1xi32>
    %69 = arith.sitofp %68 : vector<16x1xi32> to vector<16x1xf32>
    %70 = arith.subf %58, %65 : vector<16x1xf32>
    %71 = arith.mulf %70, %69 : vector<16x1xf32>
    %72 = vector.shape_cast %71 : vector<16x1xf32> to vector<1x16x1xf32>
    %cst_17 = arith.constant dense<0.000000e+00> : vector<1xf32>
    %73 = vector.multi_reduction <add>, %72, %cst_17 [1, 2] : vector<1x16x1xf32> to vector<1xf32>
    %74 = vector.shape_cast %73 : vector<1xf32> to vector<1x1x1xf32>
    %75 = vector.extract %74[0, 0, 0] : f32 from vector<1x1x1xf32>
    %76 = vector.broadcast %75 : f32 to vector<1x1xf32>
    %77 = vector.shape_cast %69 : vector<16x1xf32> to vector<1x16x1xf32>
    %cst_18 = arith.constant dense<0.000000e+00> : vector<1xf32>
    %78 = vector.multi_reduction <add>, %77, %cst_18 [1, 2] : vector<1x16x1xf32> to vector<1xf32>
    %79 = vector.shape_cast %78 : vector<1xf32> to vector<1x1x1xf32>
    %80 = vector.extract %79[0, 0, 0] : f32 from vector<1x1x1xf32>
    %81 = vector.broadcast %80 : f32 to vector<1x1xf32>
    %82 = tpu.concatenate %37, %76 in 1 : vector<1x1xf32>, vector<1x1xf32> -> vector<1x2xf32>
    %c0_19 = arith.constant 0 : index
    %c0_20 = arith.constant 0 : index
    %83 = vector.load %arg3[%c0_19, %c0_20] : memref<1x2xf32, #tpu.memory_space<vmem>>, vector<1x2xf32>
    tpu.vector_store %arg3[%c0_19, %c0_20], %82 {strides = array<i32>} : memref<1x2xf32, #tpu.memory_space<vmem>>, vector<1x2xf32>,
    %84 = tpu.concatenate %42, %81 in 1 : vector<1x1xf32>, vector<1x1xf32> -> vector<1x2xf32>
    %c0_21 = arith.constant 0 : index
    %c0_22 = arith.constant 0 : index
    %85 = vector.load %arg4[%c0_21, %c0_22] : memref<1x2xf32, #tpu.memory_space<vmem>>, vector<1x2xf32>
    tpu.vector_store %arg4[%c0_21, %c0_22], %84 {strides = array<i32>} : memref<1x2xf32, #tpu.memory_space<vmem>>, vector<1x2xf32>,
    return
  }
}

</mosaic_0001>

<bundles_post_ra>
// kernel: model_forward.4
= control target key start
LH: loop header
LB: loop body
LE: loop exit
PB: predicated region body
PF: predicated region fallthrough
CT: control target
= control target key end

     0   :  { %s717_s30 = smov 0   ;;  %s775_s0 = inlined_call_operand.vmem [shape: f32[2,8,24], index: 0, kind: input, shape index: {}]   ;;  %s776_s1 = inlined_call_operand.vmem [shape: f32[2,8,48], index: 1, kind: input, shape index: {}]   ;;  %s777_s2 = inlined_call_operand.vmem [shape: bf16[24,64], index: 2, kind: input, shape index: {}]   ;;  %s778_s3 = inlined_call_operand.vmem [shape: bf16[48,64], index: 3, kind: input, shape index: {}]   ;;  %s779_s4 = inlined_call_operand.vmem [shape: f32[1,64], index: 4, kind: input, shape index: {}]   ;;  %s780_s5 = inlined_call_operand.vmem [shape: f32[8,64], index: 5, kind: input, shape index: {}]   ;;  %s781_s6 = inlined_call_operand.vmem [shape: f32[1,64], index: 6, kind: input, shape index: {}]   ;;  %s782_s7 = inlined_call_operand.vmem [shape: f32[1,64], index: 7, kind: input, shape index: {}]   ;;  %s783_s8 = inlined_call_operand.vmem [shape: f32[1,64], index: 8, kind: input, shape index: {}]   ;;  %s784_s9 = inlined_call_operand.vmem [shape: f32[2,8,64], index: 9, kind: output, shape index: {}]  }
   0x1 LB: > { %s594_s10 = sadd.s32 4294967295, %s663_s30   ;;  %p598_p0 = scmp.ge.s32.totalorder %s663_s30, 1  ;;  %s663_s30 = sphi %s717_s30, %s19_s30  }
   0x2   : > { %p295_p1 = scmp.lt.s32.totalorder %s663_s30, 3 }
   0x4   : > { %p296_p2 = pnand %p598_p0, %p295_p1 }
   0x5   : > { %p333_p3 = scmp.lt.s32.totalorder (!%p296_p2), %s594_s10, 1 }
   0x6   : > { %299 = sbr.rel (%p296_p2) target bundleno = 536 (0x218), region = 56 }
   0xb   : > { %v650_v0 = vld [vmem:[%s778_s3 + $0x10] sm:$0xff]   ;;  %v665_v1 = vmov 0.0   ;;  %v651_v2 = vld [vmem:[%s777_s2 + $0x8] ss:$0 sps:$4 sm:$0xff]   ;;  %vm434_vm0 = vcmask 1043456   ;;  %v653_v5 = vld [vmem:[%s777_s2] sm:$0xff]  }
   0xc   : > { %622 = vmatprep.subr.bf16.mxu0 %v665_v1  ;;  %632 = vmatprep.subr.bf16.mxu1 %v665_v1  ;;  %v652_v3 = vld [vmem:[%s778_s3 + $0x8] sm:$0xff]   ;;  %v436_v4 = vsel %vm434_vm0, %v651_v2, 0  ;;  %vm666_vm1 = vmmov 0   ;;  %v654_v6 = vld [vmem:[%s778_s3] sm:$0xff]   ;;  %s786_s10 = smov (!%p333_p3, %s594_s10), 1  ;;  %vm430_vm2 = vcmask 195584  }
   0xd   : > { %623 = vmatpush3.bf16.msra.mxu0 %v650_v0  ;;  %633 = vmatpush3.bf16.msra.mxu1 %v436_v4  ;;  %s740_s21 = sshll.u32 %s786_s10, 3  ;;  %vm377_vm3 = vcmask 392192   ;;  %v609_v13 = vld [vmem:[%s779_s4] ss:$0 sm:$0xff]  ;;  %vm499_vm4 = vcmask 523264  }
   0xe   : > { %624 = vmatprep.subr.bf16.mxu0 %v665_v1  ;;  %636 = vmatprep.mubr.msk.bf16.mxu1 %vm666_vm1, %v665_v1  ;;  %s336_s24 = scalar_lea.vmem %s775_s0, %s740_s21  ;;  %s340_s27 = scalar_lea.vmem %s776_s1, %s740_s21  ;;  %v487_v20 = vld [vmem:[%s780_s5] sm:$0xff] }
   0xf   : > { %634 = vmatprep.subr.bf16.mxu1 %v665_v1  ;;  %628 = vmatprep.mubr.msk.bf16.mxu0 %vm666_vm1, %v665_v1  ;;  %v346_v7 = vld [vmem:[%s336_s24] sm:$0xff]  ;;  %s344_s20 = scalar_lea.vmem %s784_s9, %s740_s21 }
  0x10   : > { %v347_v8 = vpack.c.bf16 %v346_v7, %v346_v7  ;;  %v351_v9 = vld [vmem:[%s340_s27] sm:$0xff] }
  0x11   : > { %625 = vmatpush3.bf16.msra.mxu0 %v652_v3  ;;  %635 = vmatpush3.bf16.msra.mxu1 %v653_v5  ;;  %v352_v10 = vpack.c.bf16 %v351_v9, %v351_v9  ;;  %v610_v24 = vld [vmem:[%s781_s6] ss:$0 sm:$0xff] }
  0x12   : > { %626 = vmatprep.subr.bf16.mxu0 %v665_v1  ;;  %v611_v37 = vld [vmem:[%s782_s7] ss:$0 sm:$0xff] }
  0x13   : > { %v612_v39 = vld [vmem:[%s783_s8] ss:$0 sm:$0xff] }
  0x14   : > { %637 = vmatmul.mubr.msk.bf16.vlgmr.msra.gmra.mxu1 %vm430_vm2, %v347_v8 }
  0x15   : > { %627 = vmatpush3.bf16.msra.mxu0 %v654_v6 }
  0x18   : > { %629 = vmatmul.mubr.msk.bf16.vlgmr.msra.gmra.mxu0 %vm377_vm3, %v352_v10 }
  0xd4   : > { %v472_v11 = vpop.f32.mrf.mxu1 }
  0xd6   : > { %v638_v14 = vpop.f32.mrf.mxu1 }
  0xd8   : > { %v415_v12 = vpop.f32.mrf.mxu0  ;;  %v475_v18 = vpop.f32.mrf.mxu1 }
  0xd9   : > { %v473_v15 = vadd.f32 %v472_v11, %v415_v12 }
  0xda   : > { %v630_v16 = vpop.f32.mrf.mxu0  ;;  %v639_v22 = vpop.f32.mrf.mxu1 }
  0xdb   : > { %v485_v17 = vadd.f32 %v609_v13, %v473_v15 }
  0xdc   : > { %v418_v19 = vpop.f32.mrf.mxu0 }
  0xdd   : > { %v486_v21 = vmax.f32 %v485_v17, 0.0 }
  0xde   : > { %v631_v23 = vpop.f32.mrf.mxu0 }
  0xdf   : > { %v488_v25 = vadd.f32 %v487_v20, %v486_v21 }
  0xe1   : > { %v496_v26 = vadd.f32 %v610_v24, %v488_v25 }
  0xe3   : > { %v500_v27 = vsel %vm499_vm4, %v496_v26, 0.0 }
  0xe4   : > { %501 = vadd.xlane.f32.xlu0 %v500_v27 }
 0x16d   : > { %v502_v28 = vpop.xlane.xlu0 %501 }
 0x16e   : > { %v504_v29 = vmul.f32 0.015625, %v502_v28 }
 0x170   : > { %v505_v30 = vsub.f32 %v496_v26, %v504_v29 }
 0x172   : > { %v506_v31 = vmul.f32 %v505_v30, %v505_v30 }
 0x174   : > { %v507_v32 = vsel %vm499_vm4, %v506_v31, 0.0 }
 0x175   : > { %508 = vadd.xlane.f32.xlu0 %v507_v32 }
 0x1fe   : > { %v509_v33 = vpop.xlane.xlu0 %508 }
 0x1ff   : > { %v510_v34 = vmul.f32 0.015625, %v509_v33 }
 0x201   : > { %v511_v35 = vadd.f32 1e-12, %v510_v34 }
 0x203   : > { %655 = vrsqrt.f32 %v511_v35 }
 0x210   : > { %v656_v36 = vpop.eup %655 }
 0x211   : > { %v513_v38 = vmul.f32 %v656_v36, %v505_v30 }
 0x213   : > { %v520_v40 = vmul.f32 %v611_v37, %v513_v38 }
 0x215   : > { %v527_v41 = vadd.f32 %v612_v39, %v520_v40 }
 0x217   : > { %528 = vst.msk [vmem:[%s344_s20] sm:$0xff] %vm499_vm4, %v527_v41 }
 0x218 PF: > { %s19_s30 = sadd.s32 1, %s663_s30  }
 0x219   : > { %p16_p4 = scmp.ge.s32.totalorder %s19_s30, 4  }
 0x21b   :  { %18 = sbr.rel (!%p16_p4) target bundleno = 1 (0x1), region = 89 }

// kernel: model_forward.5
= control target key start
LH: loop header
LB: loop body
LE: loop exit
PB: predicated region body
PF: predicated region fallthrough
CT: control target
= control target key end

     0   :  { %s2023_s29 = smov 0   ;;  %s2262_s0 = inlined_call_operand.vmem [shape: f32[2,8,64], index: 0, kind: input, shape index: {}]   ;;  %s2263_s1 = inlined_call_operand.vmem [shape: f32[2,1,8], index: 1, kind: input, shape index: {}]   ;;  %s2264_s2 = inlined_call_operand.vmem [shape: bf16[64,192], index: 2, kind: input, shape index: {}]   ;;  %s2265_s3 = inlined_call_operand.vmem [shape: f32[1,192], index: 3, kind: input, shape index: {}]   ;;  %s2266_s4 = inlined_call_operand.vmem [shape: bf16[64,64], index: 4, kind: input, shape index: {}]   ;;  %s2267_s5 = inlined_call_operand.vmem [shape: f32[1,64], index: 5, kind: input, shape index: {}]   ;;  %s2268_s6 = inlined_call_operand.vmem [shape: f32[1,64], index: 6, kind: input, shape index: {}]   ;;  %s2269_s7 = inlined_call_operand.vmem [shape: f32[1,64], index: 7, kind: input, shape index: {}]   ;;  %s2270_s8 = inlined_call_operand.vmem [shape: bf16[64,128], index: 8, kind: input, shape index: {}]   ;;  %s2271_s9 = inlined_call_operand.vmem [shape: f32[1,128], index: 9, kind: input, shape index: {}]   ;;  %s2272_s10 = inlined_call_operand.vmem [shape: bf16[128,64], index: 10, kind: input, shape index: {}]   ;;  %s2273_s11 = inlined_call_operand.vmem [shape: f32[1,64], index: 11, kind: input, shape index: {}]   ;;  %s2274_s12 = inlined_call_operand.vmem [shape: f32[1,64], index: 12, kind: input, shape index: {}]   ;;  %s2275_s13 = inlined_call_operand.vmem [shape: f32[1,64], index: 13, kind: input, shape index: {}]   ;;  %s2276_s14 = inlined_call_operand.vmem [shape: f32[2,8,64], index: 14, kind: output, shape index: {}]  }
   0x1 LB: > { %s1687_s30 = sadd.s32 4294967295, %s1936_s29   ;;  %p1691_p0 = scmp.ge.s32.totalorder %s1936_s29, 1  ;;  %s1936_s29 = sphi %s2023_s29, %s24_s29  }
   0x2   : > { %p419_p1 = scmp.lt.s32.totalorder %s1936_s29, 3 }
   0x4   : > { %p420_p2 = pnand %p1691_p0, %p419_p1 }
   0x5   : > { %p466_p3 = scmp.lt.s32.totalorder (!%p420_p2), %s1687_s30, 1  ;;  %s1941_s23 = smov (!%p420_p2), 48  }
   0x6   : > { %423 = sbr.rel (%p420_p2) target bundleno = 3431 (0xd67), region = 76  ;;  %s1942_s24 = smov (!%p420_p2), 64  }
   0x7   : > { %s1943_s15 = smov (!%p420_p2), 112   ;;  %s1944_s16 = smov (!%p420_p2), 96  }
   0x8   : > { %s1945_s17 = smov (!%p420_p2), 32   ;;  %s1947_s19 = smov (!%p420_p2), 80  }
   0xb   : > { %v1880_v0 = vld [vmem:[%s2264_s2 + $0x34] ss:$8 sps:$4 sm:$0xff]   ;;  %v1882_v1 = vld [vmem:[%s2264_s2 + $0x30] ss:$8 sps:$4 sm:$0xff]   ;;  %v1938_v2 = vmov 0   ;;  %s2278_s30 = smov (!%p466_p3, %s1687_s30), 1  ;;  %v491_v12 = vlaneseq }
   0xc   : > { %577 = vmatprep.mubr.bf16.mxu0 %v1938_v2  ;;  %553 = vmatprep.subr.bf16.mxu0 %v1880_v0  ;;  %v1883_v3 = vld [vmem:[%s2264_s2 + $0x24] ss:$8 sps:$4 sm:$0xff]   ;;  %v1885_v4 = vld [vmem:[%s2264_s2 + $0x20] ss:$8 sps:$4 sm:$0xff]   ;;  %v1886_v5 = vld [vmem:[%s2264_s2 + $0x14] ss:$8 sps:$4 sm:$0xff]   ;;  %s472_s28 = scalar_lea.vmem %s2263_s1, %s2278_s30 }
   0xd   : > { %554 = vmatpush1.bf16.msra.mxu0 %v1882_v1  ;;  %s1692_s25 = sshll.u32 %s2278_s30, 3  ;;  %v1888_v6 = vld [vmem:[%s2264_s2 + $0x10] ss:$8 sps:$4 sm:$0xff]   ;;  %v1889_v7 = vld [vmem:[%s2264_s2 + $0x4] ss:$8 sps:$4 sm:$0xff]   ;;  %vm541_vm0 = vcmask 523264  }
   0xe   : > { %555 = vmatprep.subr.bf16.mxu0 %v1883_v3  ;;  %s469_s18 = scalar_lea.vmem %s2262_s0, %s1692_s25  ;;  %v1891_v8 = vld [vmem:[%s2264_s2] ss:$8 sps:$4 sm:$0xff]   ;;  %v1939_v11 = vmov 0.0   ;;  %v492_v13 = vshrl.u32 %v491_v12, 7  ;;  %vm1940_vm1 = vmmov 0   ;;  %vm589_vm2 = vcmask 130048  }
   0xf   : > { %v2063_v9 = vld [vmem:[%s469_s18] sm:$0xff]  ;;  %1778 = vmatprep.subr.mxu1 %v1939_v11  ;;  %1780 = vmatprep.mubr.msk.f32.mxu1 %vm1940_vm1, %v1939_v11  ;;  %vm672_vm3 = vcmask 64512   ;;  %s1946_s18 = smov 16   ;;  %vm1272_vm4 = vcmask 261120   ;;  %vm1274_vm5 = vcmask 392192  }
  0x10   : > { %v480_v10 = vpack.c.bf16 %v2063_v9, %v2063_v9  ;;  %v493_v14 = vsub.s32 0, %v492_v13  ;;  %v489_v15 = vld [vmem:[%s2265_s3] sm:$0x3]  ;;  %v497_v22 = vsub.s32 1, %v492_v13 }
  0x11   : > { %556 = vmatpush1.bf16.msra.mxu0 %v1885_v4  ;;  %v2096_v27 = vld [vmem:[%s472_s28] ss:$0 sm:$0xff] }
  0x12   : > { %557 = vmatprep.subr.bf16.mxu0 %v1886_v5  ;;  %v494_v16 = vrot.slane %v489_v15, %v493_v14  ;;  %v498_v23 = vrot.slane %v489_v15, %v497_v22 }
  0x15   : > { %558 = vmatpush1.bf16.msra.mxu0 %v1888_v6 }
  0x16   : > { %559 = vmatprep.subr.bf16.mxu0 %v1889_v7 }
  0x19   : > { %560 = vmatpush1.bf16.msra.mxu0 %v1891_v8 }
  0x1a   : > { %1803 = vmatprep.subr.mxu0 %v1939_v11 }
  0x1c   : > { %1702 = vmatmul.mubr.msk.bf16.vlgmr.msra.gmra.mxu0 %vm541_vm0, %v480_v10 }
  0x1d   : > { %1805 = vmatprep.mubr.msk.f32.mxu0 %vm1940_vm1, %v1939_v11 }
  0xdc   : > { %v579_v17 = vpop.f32.mrf.mxu0 }
  0xdd   : > { %v2077_v18 = vadd.f32 %v579_v17, %v494_v16 }
  0xde   : > { %v581_v19 = vpop.f32.mrf.mxu0 }
  0xdf   : > { %759 = vrot.lane.b32.xlu1 %v2077_v18, %s1941_s23  ;;  %587 = vrot.lane.b32.xlu0 %v2077_v18, %s1942_s24  ;;  %v2084_v25 = vadd.f32 %v581_v19, %v498_v23 }
  0xe0   : > { %v583_v20 = vpop.f32.mrf.mxu0 }
  0xe2   : > { %v584_v21 = vpop.f32.mrf.mxu0 }
 0x151   : > { %v588_v24 = vpop.permute.xlu0 %587  ;;  %v760_v37 = vpop.permute.xlu1 %759 }
 0x152   : > { %1779 = vmatpush3.xpose.msk.msra.mxu1 %vm589_vm2, %v588_v24 }
 0x153   : > { %1783 = vmatprep.subr.mxu1 %v1939_v11 }
 0x155   : > { %1781 = vmatmul.mubr.msk.f32.vlgmr.msra.gmra.mxu1 %vm589_vm2, %v2077_v18 }
 0x156   : > { %1784 = vmatpush3.msra.mxu1 %v2084_v25  ;;  %1785 = vmatprep.mubr.msk.f32.mxu1 %vm1940_vm1, %v1939_v11 }
 0x157   : > { %1788 = vmatprep.subr.mxu1 %v1939_v11 }
 0x215   : > { %v660_v26 = vpop.f32.mrf.mxu1 }
 0x216   : > { %v664_v28 = vmul.f32 0.25, %v660_v26 }
 0x217   : > { %v1782_v29 = vpop.f32.mrf.mxu1 }
 0x218   : > { %v671_v30 = vadd.f32 %v2096_v27, %v664_v28 }
 0x21a   : > { %v673_v31 = vsel %vm672_vm3, %v671_v30, -inf }
 0x21b   : > { %674 = vmax.xlane.f32.xlu0 %v673_v31  ;;  %v1893_v31 = vld [vmem:[%s2266_s4 + $0x10] sm:$0xff]  }
 0x231   : > { %849 = vrot.lane.b32.xlu0 %v2084_v25, %s1943_s15 }
 0x2a4   : > { %v675_v32 = vpop.xlane.xlu0 %674 }
 0x2a5   : > { %v676_v33 = vsub.f32 %v671_v30, %v675_v32  ;;  %v1894_v32 = vld [vmem:[%s2266_s4 + $0x8] sm:$0xff]  }
 0x2a7   : > { %v677_v34 = vmul.f32 1.442695, %v676_v33  ;;  %v1895_v33 = vld [vmem:[%s2266_s4] sm:$0xff]  }
 0x2a8   : > { %v850_v42 = vpop.permute.xlu0 %849 }
 0x2a9   : > { %1908 = vpow2.f32 %v677_v34 }
 0x2b6   : > { %v1909_v35 = vpop.eup %1908 }
 0x2b7   : > { %v679_v36 = vsel %vm672_vm3, %v1909_v35, 0.0 }
 0x2b8   : > { %680 = vadd.xlane.f32.xlu1 %v679_v36 }
 0x2c9   : > { %757 = vrot.lane.b32.xlu1 %v2077_v18, %s1943_s15 }
 0x341   : > { %v681_v38 = vpop.xlane.xlu1 %680 }
 0x342   : > { %1910 = vrcp.f32 %v681_v38 }
 0x345   : > { %v758_v41 = vpop.permute.xlu1 %757 }
 0x34f   : > { %v1911_v39 = vpop.eup %1910 }
 0x350   : > { %v683_v40 = vmul.f32 %v1911_v39, %v1909_v35 }
 0x352   : > { %1786 = vmatmul.mubr.msk.f32.vlgmr.msra.gmra.mxu1 %vm672_vm3, %v683_v40 }
 0x353   : > { %1789 = vmatpush3.xpose.msk.msra.mxu1 %vm589_vm2, %v760_v37  ;;  %1790 = vmatprep.mubr.msk.f32.mxu1 %vm1940_vm1, %v1939_v11 }
 0x354   : > { %1793 = vmatprep.subr.mxu1 %v1939_v11 }
 0x356   : > { %1791 = vmatmul.mubr.msk.f32.vlgmr.msra.gmra.mxu1 %vm589_vm2, %v758_v41 }
 0x357   : > { %1794 = vmatpush3.msra.mxu1 %v850_v42  ;;  %1795 = vmatprep.mubr.msk.f32.mxu1 %vm1940_vm1, %v1939_v11 }
 0x358   : > { %1798 = vmatprep.subr.mxu1 %v1939_v11 }
 0x412   : > { %v2112_v43 = vpop.f32.mrf.mxu1 }
 0x414   : > { %v1787_v44 = vpop.f32.mrf.mxu1 }
 0x416   : > { %v831_v45 = vpop.f32.mrf.mxu1 }
 0x417   : > { %v835_v46 = vmul.f32 0.25, %v831_v45 }
 0x418   : > { %v1792_v47 = vpop.f32.mrf.mxu1 }
 0x419   : > { %v836_v48 = vadd.f32 %v2096_v27, %v835_v46  ;;  %v1716_v46 = vld [vmem:[%s2267_s5] ss:$0 sm:$0xff] }
 0x41b   : > { %v837_v49 = vsel %vm672_vm3, %v836_v48, -inf }
 0x41c   : > { %838 = vmax.xlane.f32.xlu1 %v837_v49 }
 0x42d   : > { %925 = vrot.lane.b32.xlu1 %v2077_v18, %s1944_s16 }
 0x4a5   : > { %v839_v50 = vpop.xlane.xlu1 %838 }
 0x4a6   : > { %v840_v51 = vsub.f32 %v836_v48, %v839_v50 }
 0x4a8   : > { %v841_v52 = vmul.f32 1.442695, %v840_v51 }
 0x4a9   : > { %v926_v60 = vpop.permute.xlu1 %925 }
 0x4aa   : > { %1912 = vpow2.f32 %v841_v52 }
 0x4b7   : > { %v1913_v53 = vpop.eup %1912 }
 0x4b8   : > { %v843_v54 = vsel %vm672_vm3, %v1913_v53, 0.0 }
 0x4b9   : > { %844 = vadd.xlane.f32.xlu0 %v843_v54 }
 0x4cf   : > { %927 = vrot.lane.b32.xlu0 %v2077_v18, %s1945_s17 }
 0x4d3   : > { %1094 = vrot.lane.b32.xlu0 %v2077_v18, %s1946_s18 }
 0x4d7   : > { %1092 = vrot.lane.b32.xlu0 %v2077_v18, %s1947_s19 }
 0x542   : > { %v845_v55 = vpop.xlane.xlu0 %844 }
 0x543   : > { %1914 = vrcp.f32 %v845_v55 }
 0x546   : > { %v928_v56 = vpop.permute.xlu0 %927 }
 0x54a   : > { %v1095_v59 = vpop.permute.xlu0 %1094 }
 0x54e   : > { %v1093_v61 = vpop.permute.xlu0 %1092 }
 0x550   : > { %v1915_v57 = vpop.eup %1914 }
 0x551   : > { %v847_v58 = vmul.f32 %v1915_v57, %v1913_v53 }
 0x553   : > { %1796 = vmatmul.mubr.msk.f32.vlgmr.msra.gmra.mxu1 %vm672_vm3, %v847_v58  ;;  %v1896_v58 = vld [vmem:[%s2270_s8 + $0x18] sm:$0xff]  }
 0x554   : > { %1799 = vmatpush3.xpose.msk.msra.mxu1 %vm589_vm2, %v928_v56  ;;  %1800 = vmatprep.mubr.msk.f32.mxu1 %vm1940_vm1, %v1939_v11 }
 0x555   : > { %1808 = vmatprep.subr.mxu1 %v1939_v11 }
 0x557   : > { %1801 = vmatmul.mubr.msk.f32.vlgmr.msra.gmra.mxu1 %vm589_vm2, %v926_v60  ;;  %v1899_v60 = vld [vmem:[%s2270_s8] sm:$0xff]  }
 0x558   : > { %1809 = vmatpush3.xpose.msk.msra.mxu1 %vm589_vm2, %v1095_v59  ;;  %1810 = vmatprep.mubr.msk.f32.mxu1 %vm1940_vm1, %v1939_v11  ;;  %v1898_v59 = vld [vmem:[%s2270_s8 + $0x8] sm:$0xff]  }
 0x559   : > { %1842 = vmatprep.subr.bf16.mxu1 %v1939_v11 }
 0x55b   : > { %1811 = vmatmul.mubr.msk.f32.vlgmr.msra.gmra.mxu1 %vm589_vm2, %v1093_v61 }
 0x55c   : > { %1858 = vmatprep.mubr.msk.bf16.mxu1 %vm1940_vm1, %v1939_v11 }
 0x613   : > { %v921_v62 = vpop.f32.mrf.mxu1 }
 0x615   : > { %v1797_v63 = vpop.f32.mrf.mxu1 }
 0x617   : > { %v999_v0 = vpop.f32.mrf.mxu1 }
 0x618   : > { %v1003_v1 = vmul.f32 0.25, %v999_v0 }
 0x619   : > { %v1802_v2 = vpop.f32.mrf.mxu1 }
 0x61a   : > { %v1004_v3 = vadd.f32 %v2096_v27, %v1003_v1  ;;  %v1722_v1 = vld [vmem:[%s2268_s6] ss:$0 sm:$0xff] }
 0x61b   : > { %v1166_v4 = vpop.f32.mrf.mxu1 }
 0x61c   : > { %v1170_v5 = vmul.f32 0.25, %v1166_v4  ;;  %v1005_v6 = vsel %vm672_vm3, %v1004_v3, -inf }
 0x61d   : > { %1006 = vmax.xlane.f32.xlu0 %v1005_v6  ;;  %v1812_v7 = vpop.f32.mrf.mxu1 }
 0x61e   : > { %v1171_v8 = vadd.f32 %v2096_v27, %v1170_v5  ;;  %v1900_v7 = vld [vmem:[%s2272_s10 + $0x38] sm:$0xff]  }
 0x61f   : > { %1843 = vmatpush3.bf16.msra.mxu1 %v1900_v7 }
 0x620   : > { %v1172_v10 = vsel %vm672_vm3, %v1171_v8, -inf  ;;  %1844 = vmatprep.subr.bf16.mxu1 %v1939_v11 }
 0x621   : > { %1173 = vmax.xlane.f32.xlu1 %v1172_v10  ;;  %v1902_v10 = vld [vmem:[%s2272_s10 + $0x28] sm:$0xff]  }
 0x632   : > { %1183 = vrot.lane.b32.xlu1 %v2084_v25, %s1947_s19 }
 0x636   : > { %1260 = vrot.lane.b32.xlu1 %v921_v62, %s1946_s18 }
 0x6a6   : > { %v1007_v12 = vpop.xlane.xlu0 %1006 }
 0x6a7   : > { %v1008_v13 = vsub.f32 %v1004_v3, %v1007_v12  ;;  %v1723_v3 = vld [vmem:[%s2269_s7] ss:$0 sm:$0xff] }
 0x6a8   : > { %v1903_v12 = vld [vmem:[%s2272_s10 + $0x20] sm:$0xff]  }
 0x6a9   : > { %v1009_v14 = vmul.f32 1.442695, %v1008_v13  ;;  %v1904_v13 = vld [vmem:[%s2272_s10 + $0x18] sm:$0xff]  }
 0x6aa   : > { %v1174_v15 = vpop.xlane.xlu1 %1173 }
 0x6ab   : > { %1916 = vpow2.f32 %v1009_v14  ;;  %v1175_v16 = vsub.f32 %v1171_v8, %v1174_v15  ;;  %v1901_v8 = vld [vmem:[%s2272_s10 + $0x30] sm:$0xff]   ;;  %v1906_v15 = vld [vmem:[%s2272_s10 + $0x8] sm:$0xff]  }
 0x6ac   : > { %1845 = vmatpush3.bf16.msra.mxu1 %v1901_v8  ;;  %v1905_v14 = vld [vmem:[%s2272_s10 + $0x10] sm:$0xff]  }
 0x6ad   : > { %v1176_v17 = vmul.f32 1.442695, %v1175_v16  ;;  %1846 = vmatprep.subr.bf16.mxu1 %v1939_v11  ;;  %v1907_v16 = vld [vmem:[%s2272_s10] sm:$0xff]  }
 0x6ae   : > { %v1184_v28 = vpop.permute.xlu1 %1183 }
 0x6af   : > { %1918 = vpow2.f32 %v1176_v17  ;;  %v1724_v17 = vld [vmem:[%s2271_s9] ss:$0 sm:$0xff] }
 0x6b0   : > { %1847 = vmatpush3.bf16.msra.mxu1 %v1902_v10 }
 0x6b1   : > { %1848 = vmatprep.subr.bf16.mxu1 %v1939_v11 }
 0x6b2   : > { %v1261_v38 = vpop.permute.xlu1 %1260 }
 0x6b3   : > { %v1271_v40 = vsel %vm589_vm2, %v2112_v43, %v1261_v38 }
 0x6b4   : > { %1849 = vmatpush3.bf16.msra.mxu1 %v1903_v12 }
 0x6b5   : > { %1850 = vmatprep.subr.bf16.mxu1 %v1939_v11 }
 0x6b8   : > { %v1917_v18 = vpop.eup %1916  ;;  %1851 = vmatpush3.bf16.msra.mxu1 %v1904_v13 }
 0x6b9   : > { %v1011_v19 = vsel %vm672_vm3, %v1917_v18, 0.0  ;;  %1852 = vmatprep.subr.bf16.mxu1 %v1939_v11 }
 0x6ba   : > { %1012 = vadd.xlane.f32.xlu0 %v1011_v19 }
 0x6bc   : > { %v1919_v20 = vpop.eup %1918  ;;  %1853 = vmatpush3.bf16.msra.mxu1 %v1905_v14 }
 0x6bd   : > { %v1178_v21 = vsel %vm672_vm3, %v1919_v20, 0.0  ;;  %1854 = vmatprep.subr.bf16.mxu1 %v1939_v11 }
 0x6be   : > { %1179 = vadd.xlane.f32.xlu0 %v1178_v21 }
 0x6c0   : > { %1855 = vmatpush3.bf16.msra.mxu1 %v1906_v15 }
 0x6c1   : > { %1856 = vmatprep.subr.bf16.mxu1 %v1939_v11 }
 0x6c4   : > { %1857 = vmatpush3.bf16.msra.mxu1 %v1907_v16 }
 0x6d4   : > { %1016 = vrot.lane.b32.xlu0 %v2084_v25, %s1944_s16  ;;  %v1892_v25 = vld [vmem:[%s2266_s4 + $0x18] sm:$0xff]  }
 0x743   : > { %v1013_v22 = vpop.xlane.xlu0 %1012 }
 0x744   : > { %1920 = vrcp.f32 %v1013_v22 }
 0x747   : > { %v1180_v23 = vpop.xlane.xlu0 %1179 }
 0x748   : > { %1922 = vrcp.f32 %v1180_v23 }
 0x74b   : > { %v1017_v24 = vpop.permute.xlu0 %1016 }
 0x74c   : > { %1804 = vmatpush3.msra.mxu0 %v1017_v24 }
 0x74d   : > { %1813 = vmatprep.subr.mxu0 %v1939_v11 }
 0x751   : > { %v1921_v26 = vpop.eup %1920 }
 0x752   : > { %v1015_v27 = vmul.f32 %v1921_v26, %v1917_v18 }
 0x754   : > { %1806 = vmatmul.mubr.msk.f32.vlgmr.msra.gmra.mxu0 %vm672_vm3, %v1015_v27 }
 0x755   : > { %v1923_v29 = vpop.eup %1922  ;;  %1814 = vmatpush3.msra.mxu0 %v1184_v28  ;;  %1815 = vmatprep.mubr.msk.f32.mxu0 %vm1940_vm1, %v1939_v11 }
 0x756   : > { %v1182_v30 = vmul.f32 %v1923_v29, %v1919_v20  ;;  %1818 = vmatprep.subr.bf16.mxu0 %v1939_v11 }
 0x758   : > { %1816 = vmatmul.mubr.msk.f32.vlgmr.msra.gmra.mxu0 %vm672_vm3, %v1182_v30 }
 0x759   : > { %1826 = vmatprep.mubr.msk.bf16.mxu0 %vm1940_vm1, %v1939_v11  ;;  %1819 = vmatpush3.bf16.msra.mxu0 %v1892_v25 }
 0x75a   : > { %1820 = vmatprep.subr.bf16.mxu0 %v1939_v11 }
 0x75d   : > { %1821 = vmatpush3.bf16.msra.mxu0 %v1893_v31 }
 0x75e   : > { %1822 = vmatprep.subr.bf16.mxu0 %v1939_v11 }
 0x761   : > { %1823 = vmatpush3.bf16.msra.mxu0 %v1894_v32  ;;  %v1730_v32 = vld [vmem:[%s2273_s11] ss:$0 sm:$0xff] }
 0x762   : > { %1824 = vmatprep.subr.bf16.mxu0 %v1939_v11 }
 0x765   : > { %1825 = vmatpush3.bf16.msra.mxu0 %v1895_v33 }
 0x766   : > { %1830 = vmatprep.subr.bf16.mxu0 %v1939_v11 }
 0x814   : > { %v1088_v34 = vpop.f32.mrf.mxu0 }
 0x815   : > { %1264 = vrot.lane.b32.xlu0 %v1088_v34, %s1945_s17  ;;  %s476_s17 = scalar_lea.vmem %s2276_s14, %s1692_s25 }
 0x816   : > { %v1807_v35 = vpop.f32.mrf.mxu0 }
 0x818   : > { %v1255_v36 = vpop.f32.mrf.mxu0 }
 0x819   : > { %1268 = vrot.lane.b32.xlu1 %v1255_v36, %s1941_s23 }
 0x81a   : > { %v1817_v37 = vpop.f32.mrf.mxu0 }
 0x887   : > { %v1265_v39 = vpop.permute.xlu0 %1264 }
 0x888   : > { %v1273_v41 = vsel %vm1272_vm4, %v1271_v40, %v1265_v39 }
 0x88b   : > { %v1269_v42 = vpop.permute.xlu1 %1268 }
 0x88c   : > { %v1275_v44 = vsel %vm1274_vm5, %v1273_v41, %v1269_v42 }
 0x88d   : > { %v1276_v45 = vpack.c.bf16 %v1275_v44, %v1275_v44 }
 0x88f   : > { %1827 = vmatmul.mubr.msk.bf16.vlgmr.msra.gmra.mxu0 %vm541_vm0, %v1276_v45 }
 0x890   : > { %1838 = vmatprep.mubr.msk.bf16.mxu0 %vm1940_vm1, %v1939_v11  ;;  %1831 = vmatpush3.bf16.msra.mxu0 %v1896_v58 }
 0x891   : > { %1832 = vmatprep.subr.bf16.mxu0 %v1939_v11 }
 0x94f   : > { %v1353_v47 = vpop.f32.mrf.mxu0 }
 0x950   : > { %v1354_v48 = vadd.f32 %v1716_v46, %v1353_v47 }
 0x951   : > { %v1828_v49 = vpop.f32.mrf.mxu0 }
 0x952   : > { %v1359_v50 = vadd.f32 %v1354_v48, %v2063_v9  ;;  %v1897_v9 = vld [vmem:[%s2270_s8 + $0x10] sm:$0xff]  }
 0x953   : > { %v1356_v51 = vpop.f32.mrf.mxu0  ;;  %1833 = vmatpush3.bf16.msra.mxu0 %v1897_v9 }
 0x954   : > { %v1362_v43 = vsel %vm541_vm0, %v1359_v50, 0.0  ;;  %1834 = vmatprep.subr.bf16.mxu0 %v1939_v11 }
 0x955   : > { %1363 = vadd.xlane.f32.xlu0 %v1362_v43  ;;  %v1829_v52 = vpop.f32.mrf.mxu0  ;;  %v1740_v43 = vld [vmem:[%s2275_s13] ss:$0 sm:$0xff] }
 0x957   : > { %1835 = vmatpush3.bf16.msra.mxu0 %v1898_v59 }
 0x958   : > { %1836 = vmatprep.subr.bf16.mxu0 %v1939_v11 }
 0x95b   : > { %1837 = vmatpush3.bf16.msra.mxu0 %v1899_v60 }
 0x9de   : > { %v1364_v53 = vpop.xlane.xlu0 %1363 }
 0x9df   : > { %v1366_v54 = vmul.f32 0.015625, %v1364_v53 }
 0x9e1   : > { %v1367_v55 = vsub.f32 %v1359_v50, %v1366_v54  ;;  %v1739_v50 = vld [vmem:[%s2274_s12] ss:$0 sm:$0xff] }
 0x9e3   : > { %v1368_v56 = vmul.f32 %v1367_v55, %v1367_v55 }
 0x9e5   : > { %v1369_v57 = vsel %vm541_vm0, %v1368_v56, 0.0 }
 0x9e6   : > { %1370 = vadd.xlane.f32.xlu1 %v1369_v57 }
 0xa6f   : > { %v1371_v61 = vpop.xlane.xlu1 %1370 }
 0xa70   : > { %v1372_v62 = vmul.f32 0.015625, %v1371_v61 }
 0xa72   : > { %v1373_v63 = vadd.f32 1e-12, %v1372_v62 }
 0xa74   : > { %1924 = vrsqrt.f32 %v1373_v63 }
 0xa81   : > { %v1925_v0 = vpop.eup %1924 }
 0xa82   : > { %v1375_v2 = vmul.f32 %v1925_v0, %v1367_v55 }
 0xa84   : > { %v1382_v4 = vmul.f32 %v1722_v1, %v1375_v2 }
 0xa86   : > { %v1389_v5 = vadd.f32 %v1723_v3, %v1382_v4 }
 0xa88   : > { %v1390_v6 = vpack.c.bf16 %v1389_v5, %v1389_v5 }
 0xa8a   : > { %1839 = vmatmul.mubr.msk.bf16.vlgmr.msra.gmra.mxu0 %vm541_vm0, %v1390_v6 }
 0xb4a   : > { %v1467_v18 = vpop.f32.mrf.mxu0 }
 0xb4b   : > { %v1468_v19 = vadd.f32 %v1724_v17, %v1467_v18 }
 0xb4c   : > { %v1840_v20 = vpop.f32.mrf.mxu0 }
 0xb4d   : > { %v1473_v21 = vmul.f32 %v1468_v19, %v1468_v19 }
 0xb4e   : > { %v1470_v22 = vpop.f32.mrf.mxu0 }
 0xb4f   : > { %v1474_v23 = vmul.f32 %v1473_v21, %v1468_v19 }
 0xb50   : > { %v1841_v24 = vpop.f32.mrf.mxu0 }
 0xb51   : > { %v1475_v26 = vmul.f32 0.044715, %v1474_v23 }
 0xb53   : > { %v1476_v27 = vadd.f32 %v1475_v26, %v1468_v19 }
 0xb55   : > { %v1477_v28 = vmul.f32 0.7978846, %v1476_v27 }
 0xb57   : > { %1926 = vtanh.f32 %v1477_v28 }
 0xb64   : > { %v1927_v29 = vpop.eup %1926 }
 0xb65   : > { %v1479_v30 = vadd.f32 1.0, %v1927_v29 }
 0xb67   : > { %v1480_v25 = vmul.f32 0.5, %v1479_v30 }
 0xb69   : > { %v1481_v11 = vmul.f32 %v1480_v25, %v1468_v19 }
 0xb6b   : > { %v1482_v31 = vpack.c.bf16 %v1481_v11, %v1481_v11 }
 0xb6d   : > { %1859 = vmatmul.mubr.bf16.vlgmr.msra.gmra.mxu1 %v1482_v31 }
 0xc2d   : > { %v1588_v33 = vpop.f32.mrf.mxu1 }
 0xc2e   : > { %v1589_v34 = vadd.f32 %v1730_v32, %v1588_v33 }
 0xc2f   : > { %v1860_v35 = vpop.f32.mrf.mxu1 }
 0xc30   : > { %v1594_v36 = vadd.f32 %v1589_v34, %v1389_v5 }
 0xc31   : > { %v1591_v37 = vpop.f32.mrf.mxu1 }
 0xc32   : > { %v1597_v38 = vsel %vm541_vm0, %v1594_v36, 0.0 }
 0xc33   : > { %1598 = vadd.xlane.f32.xlu0 %v1597_v38  ;;  %v1861_v39 = vpop.f32.mrf.mxu1 }
 0xcbc   : > { %v1599_v40 = vpop.xlane.xlu0 %1598 }
 0xcbd   : > { %v1600_v41 = vmul.f32 0.015625, %v1599_v40 }
 0xcbf   : > { %v1601_v42 = vsub.f32 %v1594_v36, %v1600_v41 }
 0xcc1   : > { %v1602_v44 = vmul.f32 %v1601_v42, %v1601_v42 }
 0xcc3   : > { %v1603_v45 = vsel %vm541_vm0, %v1602_v44, 0.0 }
 0xcc4   : > { %1604 = vadd.xlane.f32.xlu0 %v1603_v45 }
 0xd4d   : > { %v1605_v46 = vpop.xlane.xlu0 %1604 }
 0xd4e   : > { %v1606_v47 = vmul.f32 0.015625, %v1605_v46 }
 0xd50   : > { %v1607_v48 = vadd.f32 1e-12, %v1606_v47 }
 0xd52   : > { %1928 = vrsqrt.f32 %v1607_v48 }
 0xd5f   : > { %v1929_v49 = vpop.eup %1928 }
 0xd60   : > { %v1609_v51 = vmul.f32 %v1929_v49, %v1601_v42 }
 0xd62   : > { %v1616_v52 = vmul.f32 %v1739_v50, %v1609_v51 }
 0xd64   : > { %v1623_v53 = vadd.f32 %v1740_v43, %v1616_v52 }
 0xd66   : > { %1624 = vst.msk [vmem:[%s476_s17] sm:$0xff] %vm541_vm0, %v1623_v53 }
 0xd67 PF: > { %s24_s29 = sadd.s32 1, %s1936_s29  }
 0xd68   : > { %p21_p4 = scmp.ge.s32.totalorder %s24_s29, 4  }
 0xd6a   :  { %23 = sbr.rel (!%p21_p4) target bundleno = 1 (0x1), region = 109 }

// kernel: model_forward.7
= control target key start
LH: loop header
LB: loop body
LE: loop exit
PB: predicated region body
PF: predicated region fallthrough
CT: control target
= control target key end

     0   :  { %v361_v1 = vmov 0   ;;  %v362_v2 = vmov 1   ;;  %vm68_vm0 = vcmask 523264   ;;  %v115_v15 = vlaneseq  ;;  %s472_s1 = inlined_call_operand.vmem [shape: bf16[64,256], index: 1, kind: input, shape index: {}]   ;;  %s473_s2 = inlined_call_operand.vmem [shape: s32[16,2], index: 2, kind: input, shape index: {}]   ;;  %s474_s0 = inlined_call_operand.vmem [shape: f32[16,64], index: 0, kind: input, shape index: {}]   ;;  %s475_s3 = inlined_call_operand.vmem [shape: f32[1,2], index: 3, kind: output, shape index: {0}]   ;;  %s476_s4 = inlined_call_operand.vmem [shape: f32[1,2], index: 4, kind: output, shape index: {1}]  }
   0x1   :  { %v333_v0 = vld [vmem:[%s472_s1 + $0x34] ss:$8 sps:$4 sm:$0xff]   ;;  %104 = vmatprep.mubr.bf16.mxu0 %v361_v1  ;;  %324 = vset.pattern.permute.xlu1 %v362_v2  ;;  %v335_v3 = vld [vmem:[%s472_s1 + $0x30] ss:$8 sps:$4 sm:$0xff]   ;;  %v336_v4 = vld [vmem:[%s472_s1 + $0x24] ss:$8 sps:$4 sm:$0xff]  }
   0x2   :  { %325 = vset.pattern.permute.xlu0 %v361_v1  ;;  %80 = vmatprep.subr.bf16.mxu0 %v333_v0  ;;  %v338_v5 = vld [vmem:[%s472_s1 + $0x20] ss:$8 sps:$4 sm:$0xff]   ;;  %v339_v6 = vld [vmem:[%s472_s1 + $0x14] ss:$8 sps:$4 sm:$0xff]   ;;  %v341_v8 = vld [vmem:[%s472_s1 + $0x10] ss:$8 sps:$4 sm:$0xff]  }
   0x3   :  { %81 = vmatpush1.bf16.msra.mxu0 %v335_v3  ;;  %v409_v7 = vld [vmem:[%s473_s2] sm:$0xff]  ;;  %v421_v10 = vld [vmem:[%s473_s2 + $0x8] sm:$0xff]  ;;  %v433_v16 = vand.u32 127, %v115_v15  ;;  %v363_v26 = vmov 0.0   ;;  %vm170_vm9 = vcmask 7168   ;;  %vm285_vm10 = vcmask 8192  }
   0x4   :  { %82 = vmatprep.subr.bf16.mxu0 %v336_v4  ;;  %221 = vperm.xlu1 %324, %v409_v7   ;;  %v342_v9 = vld [vmem:[%s472_s1 + $0x4] ss:$8 sps:$4 sm:$0xff]   ;;  %v344_v11 = vld [vmem:[%s472_s1] ss:$8 sps:$4 sm:$0xff]   ;;  %vm160_vm7 = vcmp.ge.s32.totalorder %v409_v7, 0  ;;  %vm161_vm8 = vcmp.ge.s32.totalorder %v421_v10, 0 }
   0x5   :  { %v17_v12 = vld [vmem:[%s474_s0] sm:$0xff]  ;;  %v18_v13 = vld [vmem:[%s474_s0 + $0x8] sm:$0xff]  ;;  %vm197_vm1 = vcmp.lt.s32.totalorder %v433_v16, 40  ;;  %vm117_vm2 = vcmp.lt.s32.totalorder %v433_v16, 30  ;;  %v308_v61 = vsel %vm160_vm7, 1.0, %v363_v26  ;;  %s364_s0 = smov 127  }
   0x6   :  { %v19_v14 = vpack.c.bf16 %v18_v13, %v17_v12  ;;  %v309_v4 = vsel %vm161_vm8, 1.0, %v363_v26 }
   0x7   :  { %83 = vmatpush1.bf16.msra.mxu0 %v338_v5 }
   0x8   :  { %84 = vmatprep.subr.bf16.mxu0 %v339_v6  ;;  %224 = vperm.xlu1 %324, %v421_v10   ;;  %v327_v6 = vpack.i.bf16 %v309_v4, %v308_v61 }
   0xb   :  { %85 = vmatpush1.bf16.msra.mxu0 %v341_v8  ;;  %v185_v8 = vsel %vm170_vm9, %v309_v4, 0.0 }
   0xc   :  { %86 = vmatprep.subr.bf16.mxu0 %v342_v9  ;;  %326 = vset.pattern.permute.xlu1 %v361_v1 }
   0xf   :  { %87 = vmatpush1.bf16.msra.mxu0 %v344_v11 }
  0x12   :  { %305 = vmatmul.mubr.msk.bf16.vlgmr.msra.gmra.mxu0 %vm68_vm0, %v19_v14 }
  0x7f   :  { %v222_v25 = vpop.permute.xlu1 %221 }
  0x80   :  { %vm226_vm3 = vcmp.eq.s32.totalorder %v433_v16, %v222_v25 }
  0x81   :  { %v310_v27 = vsel %vm226_vm3, 1.0, %v363_v26 }
  0x83   :  { %v225_v29 = vpop.permute.xlu1 %224 }
  0x84   :  { %vm227_vm5 = vcmp.eq.s32.totalorder %v433_v16, %v225_v29 }
  0x85   :  { %v311_v48 = vsel %vm227_vm5, 1.0, %v363_v26 }
  0xd2   :  { %v106_v17 = vpop.f32.mrf.mxu0 }
  0xd3   :  { %v118_v24 = vsel %vm117_vm2, %v106_v17, -1e+30 }
  0xd4   :  { %v108_v18 = vpop.f32.mrf.mxu0 }
  0xd5   :  { %v198_v19 = vsel %vm197_vm1, %v108_v18, -1e+30 }
  0xd6   :  { %200 = vmax.xlane.f32.xlu0 %v198_v19  ;;  %v110_v20 = vpop.f32.mrf.mxu0  ;;  %v232_v28 = vmul.f32 %v310_v27, %v198_v19 }
  0xd7   :  { %v119_v21 = vsel %vm117_vm2, %v110_v20, -1e+30 }
  0xd8   :  { %124 = vmax.xlane.f32.xlu1 %v119_v21  ;;  %v112_v22 = vpop.f32.mrf.mxu0 }
  0xd9   :  { %v199_v23 = vsel %vm197_vm1, %v112_v22, -1e+30 }
  0xda   :  { %202 = vmax.xlane.f32.xlu0 %v199_v23  ;;  %v233_v49 = vmul.f32 %v311_v48, %v199_v23 }
  0xde   :  { %122 = vmax.xlane.f32.xlu0 %v118_v24 }
  0xe9   :  { %146 = vperm.xlu1 %326, %v421_v10  }
 0x10d   :  { %234 = vadd.xlane.f32.xlu1 %v232_v28 }
 0x15f   :  { %v201_v30 = vpop.xlane.xlu0 %200 }
 0x160   :  { %v204_v31 = vsub.f32 %v198_v19, %v201_v30 }
 0x161   :  { %v440_v32 = vpop.xlane.xlu1 %124 }
 0x162   :  { %v206_v33 = vmul.f32 1.442695, %v204_v31  ;;  %v127_v34 = vsub.f32 %v119_v21, %v440_v32 }
 0x163   :  { %v203_v35 = vpop.xlane.xlu0 %202 }
 0x164   :  { %345 = vpow2.f32 %v206_v33  ;;  %v130_v36 = vmul.f32 1.442695, %v127_v34  ;;  %v205_v37 = vsub.f32 %v199_v23, %v203_v35 }
 0x165   :  { %v147_v39 = vpop.permute.xlu1 %146 }
 0x166   :  { %347 = vpow2.f32 %v130_v36  ;;  %v208_v38 = vmul.f32 1.442695, %v205_v37  ;;  %vm149_vm4 = vcmp.eq.s32.totalorder %v433_v16, %v147_v39 }
 0x167   :  { %v307_v42 = vsel %vm149_vm4, 1.0, %v363_v26  ;;  %v123_v45 = vpop.xlane.xlu0 %122 }
 0x168   :  { %349 = vpow2.f32 %v208_v38  ;;  %v155_v44 = vmul.f32 %v307_v42, %v119_v21  ;;  %v126_v46 = vsub.f32 %v118_v24, %v123_v45 }
 0x16a   :  { %v128_v47 = vmul.f32 1.442695, %v126_v46 }
 0x16c   :  { %351 = vpow2.f32 %v128_v47 }
 0x171   :  { %v346_v40 = vpop.eup %345 }
 0x172   :  { %210 = vadd.xlane.f32.xlu0 %v346_v40 }
 0x173   :  { %v348_v41 = vpop.eup %347 }
 0x174   :  { %134 = vadd.xlane.f32.xlu1 %v348_v41 }
 0x175   :  { %v350_v43 = vpop.eup %349 }
 0x176   :  { %212 = vadd.xlane.f32.xlu0 %v350_v43 }
 0x178   :  { %158 = vadd.xlane.f32.xlu1 %v155_v44 }
 0x179   :  { %v352_v50 = vpop.eup %351 }
 0x18c   :  { %143 = vperm.xlu0 %325, %v409_v7   ;;  %v184_v7 = vsel %vm170_vm9, %v308_v61, 0.0 }
 0x18d   :  { %v186_v9 = vadd.f32 %v185_v8, %v184_v7 }
 0x190   :  { %332 = vset.pattern.permute.xlu0 %v362_v2 }
 0x196   :  { %v235_v59 = vpop.xlane.xlu1 %234 }
 0x1ab   :  { %236 = vadd.xlane.f32.xlu0 %v233_v49 }
 0x1af   :  { %132 = vadd.xlane.f32.xlu0 %v352_v50 }
 0x1fb   :  { %v211_v51 = vpop.xlane.xlu0 %210 }
 0x1fc   :  { %353 = vlog2.f32 %v211_v51 }
 0x1fd   :  { %v135_v11 = vpop.xlane.xlu1 %134 }
 0x1ff   :  { %v213_v52 = vpop.xlane.xlu0 %212 }
 0x200   :  { %355 = vlog2.f32 %v213_v52 }
 0x201   :  { %357 = vlog2.f32 %v135_v11  ;;  %v159_v17 = vpop.xlane.xlu1 %158 }
 0x207   :  { %v144_v53 = vpop.permute.xlu0 %143 }
 0x208   :  { %vm148_vm6 = vcmp.eq.s32.totalorder %v433_v16, %v144_v53 }
 0x209   :  { %v306_v54 = vsel %vm148_vm6, 1.0, %v363_v26  ;;  %v354_v56 = vpop.eup %353 }
 0x20a   :  { %v154_v55 = vmul.f32 %v306_v54, %v118_v24  ;;  %v215_v57 = vmul.f32 0.6931472, %v354_v56 }
 0x20c   :  { %156 = vadd.xlane.f32.xlu0 %v154_v55  ;;  %v218_v58 = vadd.f32 %v215_v57, %v201_v30 }
 0x20d   :  { %v356_v63 = vpop.eup %355 }
 0x20e   :  { %v238_v60 = vsub.f32 %v218_v58, %v235_v59  ;;  %v217_v0 = vmul.f32 0.6931472, %v356_v63  ;;  %v358_v10 = vpop.eup %357 }
 0x20f   :  { %v139_v13 = vmul.f32 0.6931472, %v358_v10 }
 0x210   :  { %v240_v62 = vmul.f32 %v308_v61, %v238_v60  ;;  %v219_v1 = vadd.f32 %v217_v0, %v203_v35 }
 0x211   :  { %v141_v15 = vadd.f32 %v139_v13, %v440_v32 }
 0x213   :  { %v167_v18 = vsub.f32 %v141_v15, %v159_v17 }
 0x215   :  { %v169_v21 = vmul.f32 %v309_v4, %v167_v18 }
 0x217   :  { %v172_v25 = vsel %vm170_vm9, %v169_v21, 0.0 }
 0x222   :  { %244 = vrot.lane.b32.xlu0 %v240_v62, %s364_s0 }
 0x234   :  { %v237_v2 = vpop.xlane.xlu0 %236 }
 0x235   :  { %v239_v3 = vsub.f32 %v219_v1, %v237_v2 }
 0x237   :  { %v241_v5 = vmul.f32 %v309_v4, %v239_v3 }
 0x238   :  { %v133_v12 = vpop.xlane.xlu0 %132 }
 0x239   :  { %246 = vrot.lane.b32.xlu1 %v241_v5, %s364_s0  ;;  %359 = vlog2.f32 %v133_v12 }
 0x23d   :  { %328 = vrot.lane.b32.xlu1 %v327_v6, %s364_s0 }
 0x246   :  { %v360_v14 = vpop.eup %359 }
 0x247   :  { %v137_v16 = vmul.f32 0.6931472, %v360_v14 }
 0x249   :  { %v140_v19 = vadd.f32 %v137_v16, %v123_v45 }
 0x261   :  { %187 = vadd.xlane.f32.xlu1 %v186_v9 }
 0x295   :  { %v157_v20 = vpop.xlane.xlu0 %156 }
 0x296   :  { %v166_v22 = vsub.f32 %v140_v19, %v157_v20 }
 0x298   :  { %v168_v23 = vmul.f32 %v308_v61, %v166_v22 }
 0x299   :  { %v245_v27 = vpop.permute.xlu0 %244 }
 0x29a   :  { %v171_v24 = vsel %vm170_vm9, %v168_v23, 0.0  ;;  %v250_v29 = vsel %vm170_vm9, %v245_v27, 0.0 }
 0x29b   :  { %v173_v26 = vadd.f32 %v172_v25, %v171_v24 }
 0x29d   :  { %174 = vadd.xlane.f32.xlu0 %v173_v26 }
 0x2ab   :  { %v247_v28 = vpop.permute.xlu1 %246 }
 0x2ac   :  { %v251_v30 = vsel %vm170_vm9, %v247_v28, 0.0 }
 0x2ad   :  { %v252_v31 = vadd.f32 %v251_v30, %v250_v29 }
 0x2af   :  { %v329_v32 = vpop.permute.xlu1 %328  ;;  %253 = vadd.xlane.f32.xlu0 %v252_v31 }
 0x2b0   :  { %v331_v33 = vunpack.i.h.bf16 %v329_v32  ;;  %v330_v34 = vunpack.i.l.bf16 %v329_v32 }
 0x2b2   :  { %v271_v35 = vsel %vm170_vm9, %v330_v34, 0.0  ;;  %v272_v36 = vsel %vm170_vm9, %v331_v33, 0.0 }
 0x2b3   :  { %v273_v37 = vadd.f32 %v272_v36, %v271_v35 }
 0x2b5   :  { %274 = vadd.xlane.f32.xlu0 %v273_v37 }
 0x2ea   :  { %v188_v38 = vpop.xlane.xlu1 %187 }
 0x2eb   :  { %v189_v39 = vrot.slane %v188_v38, 4 }
 0x2ed   :  { %v190_v40 = vadd.f32 %v189_v39, %v188_v38 }
 0x2ef   :  { %v191_v41 = vrot.slane %v190_v40, 2 }
 0x2f1   :  { %v192_v44 = vadd.f32 %v191_v41, %v190_v40 }
 0x2f3   :  { %v193_v47 = vrot.slane %v192_v44, 1 }
 0x2f5   :  { %v194_v50 = vadd.f32 %v193_v47, %v192_v44 }
 0x326   :  { %v175_v42 = vpop.xlane.xlu0 %174 }
 0x327   :  { %v176_v43 = vrot.slane %v175_v42, 4 }
 0x329   :  { %v177_v45 = vadd.f32 %v176_v43, %v175_v42 }
 0x32b   :  { %v178_v46 = vrot.slane %v177_v45, 2 }
 0x32d   :  { %v179_v48 = vadd.f32 %v178_v46, %v177_v45 }
 0x32f   :  { %v180_v49 = vrot.slane %v179_v48, 1 }
 0x331   :  { %v181_v51 = vadd.f32 %v180_v49, %v179_v48 }
 0x333   :  { %312 = vpush %v181_v51 }
 0x334   :  { %314 = vpush %v194_v50 }
 0x338   :  { %v254_v52 = vpop.xlane.xlu0 %253 }
 0x339   :  { %v255_v53 = vrot.slane %v254_v52, 4 }
 0x33b   :  { %v256_v54 = vadd.f32 %v255_v53, %v254_v52 }
 0x33d   :  { %v257_v55 = vrot.slane %v256_v54, 2 }
 0x33e   :  { %v275_v56 = vpop.xlane.xlu0 %274 }
 0x33f   :  { %v276_v57 = vrot.slane %v275_v56, 4  ;;  %v258_v58 = vadd.f32 %v257_v55, %v256_v54 }
 0x341   :  { %v277_v59 = vadd.f32 %v276_v57, %v275_v56  ;;  %v259_v60 = vrot.slane %v258_v58, 1 }
 0x343   :  { %v278_v61 = vrot.slane %v277_v59, 2  ;;  %v260_v62 = vadd.f32 %v259_v60, %v258_v58 }
 0x345   :  { %v279_v63 = vadd.f32 %v278_v61, %v277_v59  ;;  %316 = vpush %v260_v62 }
 0x347   :  { %v280_v0 = vrot.slane %v279_v63, 1 }
 0x349   :  { %v281_v1 = vadd.f32 %v280_v0, %v279_v63 }
 0x34b   :  { %318 = vpush %v281_v1 }
 0x364   :  { %s313_s1 = spop %312 }
 0x365   :  { %s315_s2 = spop %314  ;;  %v183_v2 = vstv %s313_s1 }
 0x366   :  { %v196_v5 = vstv %s315_s2 }
 0x376   :  { %s317_s13 = spop %316 }
 0x377   :  { %v262_v3 = vstv %s317_s13 }
 0x378   :  { %v284_v4 = vsel %vm170_vm9, %v183_v2, %v262_v3 }
 0x379   :  { %286 = vst.msk [vmem:[%s475_s3] sm:$0x1] %vm285_vm10, %v284_v4 }
 0x37c   :  { %s319_s16 = spop %318 }
 0x37d   :  { %v283_v6 = vstv %s319_s16 }
 0x37e   :  { %v287_v7 = vsel %vm170_vm9, %v196_v5, %v283_v6 }
 0x37f   :  { %288 = vst.msk [vmem:[%s476_s4] sm:$0x1] %vm285_vm10, %v287_v7 }

</bundles_post_ra>
